<compile_context>
chip_gen: v7x
topology: tpu7x:2x2x1
jax: 0.10.0
libtpu: 0.0.40
codegen_flags: <defaults>
</compile_context>

<pallas_src>
import functools

import numpy as np
import jax
import jax.numpy as jnp
from jax.experimental import pallas as pl
from jax.experimental.pallas import tpu as pltpu

GN_EPS = 1e-5
NUM_GROUPS = 32


# --------------------------------------------------------------------------
# Fused kernel: all 4 layers for one batch sample, everything resident in VMEM
# --------------------------------------------------------------------------
def _mlp_fused_kernel(x_ref, w0_ref, w1_ref, w2a_ref, w2b_ref, w3_ref,
                      gmat_ref, vec_ref, o_ref,
                      *, eps, out_scale, out_bias, group_size):
    # Residual input, cast once to bf16 and reused by layer 0 and layer 2.
    x_bf = x_ref[...].astype(jnp.bfloat16)                # (C0, N)
    gmat = gmat_ref[...]                                   # (C, C) 0/1 membership, f32
    vecs = vec_ref[...]                                    # (C, 8) packed per-channel vectors

    def gn_silu(h, gamma, beta):
        # Lane-reduce first (XLU), then a tiny (C,C)@(C,1) matmul broadcasts
        # the per-group sums back to every member channel.  Two-pass variance
        # (no E[x^2]-E[x]^2 cancellation); 1/(group_size*N) applied here so
        # nothing about N is baked into the parameters.
        inv = 1.0 / (group_size * h.shape[-1])
        s = jnp.sum(h, axis=-1, keepdims=True)             # (C, 1)
        mean = jnp.dot(gmat, s, preferred_element_type=jnp.float32) * inv
        d = h - mean
        s2 = jnp.sum(d * d, axis=-1, keepdims=True)        # (C, 1)
        var = jnp.dot(gmat, s2, preferred_element_type=jnp.float32) * inv
        a = gamma * jax.lax.rsqrt(var + eps)               # fold GN affine scale
        hn = d * a + beta                                   # fold GN affine shift
        return hn * jax.nn.sigmoid(hn)                      # SiLU (sigmoid -> EUP)

    # layer 0: 1x1 conv + GroupNorm + SiLU
    h = jnp.dot(w0_ref[...], x_bf, preferred_element_type=jnp.float32) + vecs[:, 0:1]
    y = gn_silu(h, vecs[:, 1:2], vecs[:, 2:3])

    # layer 1: 1x1 conv + GroupNorm + SiLU
    h = jnp.dot(w1_ref[...], y.astype(jnp.bfloat16),
                preferred_element_type=jnp.float32) + vecs[:, 3:4]
    y = gn_silu(h, vecs[:, 4:5], vecs[:, 5:6])

    # layer 2: residual layer; concat([y, x]) folded into split weights.
    # No norm / activation (i == len(filters) - 2 in the PyTorch module).
    y = (jnp.dot(w2a_ref[...], y.astype(jnp.bfloat16), preferred_element_type=jnp.float32)
         + jnp.dot(w2b_ref[...], x_bf, preferred_element_type=jnp.float32)
         + vecs[:, 6:7])

    # layer 3: 1x1 conv, then output_scale * (y + output_bias); last_op=None
    c_out = o_ref.shape[0]
    h = jnp.dot(w3_ref[...], y.astype(jnp.bfloat16),
                preferred_element_type=jnp.float32) + vecs[0:c_out, 7:8]
    o_ref[...] = (out_scale * (h + out_bias)).astype(o_ref.dtype)


# --------------------------------------------------------------------------
# Wrapper: single pallas_call, grid over batch, NCW in / NCW out (no transposes)
# --------------------------------------------------------------------------
def mlp_forward(feature_bcn, params, *, output_scale=1.0, output_bias=0.0):
    """feature_bcn: [B, C_in, N] (PyTorch NCW).  Returns [B, C_out, N]."""
    B, C0, N = feature_bcn.shape
    c_mid = params["w1"].shape[0]                 # 64
    c_out = params["w3"].shape[0]                 # 8
    group_size = c_mid // NUM_GROUPS

    # Weights: bf16 for the MXU (f32 accumulation in-kernel).  Residual concat
    # at layer 2 is folded into split weights.
    w0 = params["w0"].astype(jnp.bfloat16)
    w1 = params["w1"].astype(jnp.bfloat16)
    w2a = params["w2"][:, :c_mid].astype(jnp.bfloat16)    # applied to y
    w2b = params["w2"][:, c_mid:].astype(jnp.bfloat16)    # applied to x (residual)
    w3 = params["w3"].astype(jnp.bfloat16)
    gmat = params["gmat"]                                  # (c_mid, c_mid) 0/1, f32

    # Pack the eight (C,1) per-channel vectors into one (c_mid, 8) f32 tile
    # (b0, g0, be0, b1, g1, be1, b2, b3-zero-padded) -> one DMA, one VMEM tile.
    def col(v):
        out = jnp.zeros((c_mid,), jnp.float32)
        return out.at[:v.shape[0]].set(v[:, 0])
    vecs = jnp.stack(
        [col(params["b0"]), col(params["gamma0"]), col(params["beta0"]),
         col(params["b1"]), col(params["gamma1"]), col(params["beta1"]),
         col(params["b2"]), col(params["b3"])], axis=1)    # (c_mid, 8)

    kernel = functools.partial(_mlp_fused_kernel, eps=GN_EPS,
                               out_scale=output_scale, out_bias=output_bias,
                               group_size=group_size)

    def full_spec(a):
        # grid-invariant parameter: whole array in VMEM, same block every step
        return pl.BlockSpec(a.shape, lambda i: (0,) * a.ndim)

    args = (feature_bcn, w0, w1, w2a, w2b, w3, gmat, vecs)
    in_specs = [pl.BlockSpec((None, C0, N), lambda i: (i, 0, 0))]
    in_specs += [full_spec(a) for a in args[1:]]

    # Advisory cost hint: the kernel is overhead-bound at this size.
    flops = 2 * B * N * (c_mid * C0 + c_mid * c_mid + c_mid * (c_mid + C0) + c_out * c_mid)
    transcendentals = 2 * B * c_mid * N           # two sigmoids per sample (+rsqrt, small)
    bytes_accessed = int(feature_bcn.size) * 4 + B * c_out * N * 4 + sum(
        int(a.size) * int(a.dtype.itemsize) for a in args[1:])

    return pl.pallas_call(
        kernel,
        out_shape=jax.ShapeDtypeStruct((B, c_out, N), jnp.float32),
        grid=(B,),
        in_specs=in_specs,
        out_specs=pl.BlockSpec((None, c_out, N), lambda i: (i, 0, 0)),
        compiler_params=pltpu.CompilerParams(dimension_semantics=("parallel",)),
        cost_estimate=pl.CostEstimate(flops=int(flops),
                                      transcendentals=int(transcendentals),
                                      bytes_accessed=int(bytes_accessed)),
    )(*args)


# --------------------------------------------------------------------------
# Parameter init (deterministic, PyTorch Conv1d / GroupNorm shapes)
# --------------------------------------------------------------------------
def init_params(key, filter_channels, res_layers):
    L = len(filter_channels) - 1
    params = {}
    for l in range(L):
        cin = filter_channels[l] + (filter_channels[0] if l in res_layers else 0)
        cout = filter_channels[l + 1]
        key, k1, k2, k3, k4 = jax.random.split(key, 5)
        bound = 1.0 / np.sqrt(cin)
        # PyTorch Conv1d weight (Cout, Cin, 1) -> stored (Cout, Cin)
        params[f"w{l}"] = jax.random.uniform(k1, (cout, cin), jnp.float32, -bound, bound)
        params[f"b{l}"] = jax.random.uniform(k2, (cout, 1), jnp.float32, -bound, bound)
        if l < L - 2:  # only layers 0..L-3 run GroupNorm+SiLU in forward
            params[f"gamma{l}"] = 1.0 + 0.1 * jax.random.normal(k3, (cout, 1), jnp.float32)
            params[f"beta{l}"] = 0.1 * jax.random.normal(k4, (cout, 1), jnp.float32)

    # Shared group-membership matrix (both GN layers have the same C).
    # Pure 0/1 membership: all scaling (1/(group_size*N)) is applied in-kernel
    # so the kernel is valid for any runtime N.
    c_gn = filter_channels[1]
    assert c_gn % NUM_GROUPS == 0, "GroupNorm requires C % 32 == 0"
    group_size = c_gn // NUM_GROUPS
    gid = np.arange(c_gn) // group_size
    gmat = (gid[:, None] == gid[None, :]).astype(np.float32)
    params["gmat"] = jnp.asarray(gmat)
    return params


# --------------------------------------------------------------------------
# Pure-JAX reference (mirrors the PyTorch forward for this config)
# --------------------------------------------------------------------------
def mlp_reference(feature_bcn, params, filter_channels, res_layers,
                  output_scale=1.0, output_bias=0.0, dot_dtype=jnp.float32):
    y = feature_bcn
    tmpy = feature_bcn
    L = len(filter_channels) - 1
    for i in range(L):
        inp = jnp.concatenate([y, tmpy], axis=1) if i in res_layers else y
        w = params[f"w{i}"]                     # (Cout, Cin)
        b = params[f"b{i}"]                     # (Cout, 1)
        h = jnp.einsum("oc,bcn->bon", w.astype(dot_dtype), inp.astype(dot_dtype),
                       preferred_element_type=jnp.float32) + b[None, :, :]
        if i < L - 2:
            B, C, N = h.shape
            hg = h.reshape(B, NUM_GROUPS, C // NUM_GROUPS, N)
            mean = hg.mean(axis=(2, 3), keepdims=True)
            var = ((hg - mean) ** 2).mean(axis=(2, 3), keepdims=True)
            hn = ((hg - mean) / jnp.sqrt(var + GN_EPS)).reshape(B, C, N)
            hn = hn * params[f"gamma{i}"][None, :, :] + params[f"beta{i}"][None, :, :]
            h = hn * jax.nn.sigmoid(hn)
        y = h
    return output_scale * (y + output_bias)


# --------------------------------------------------------------------------
if __name__ == "__main__":
    filter_channels = [16, 64, 64, 64, 8]
    res_layers = [2]
    B, N = 2, 256

    key = jax.random.PRNGKey(0)
    key, kx = jax.random.split(key)
    feature = jax.random.normal(kx, (B, filter_channels[0], N), jnp.float32)  # [B, C_in, N]

    params = init_params(key, filter_channels, res_layers)

    out = jax.block_until_ready(mlp_forward(feature, params))
    assert out.shape == (B, filter_channels[-1], N), out.shape

    # Tight check vs. a reference that also feeds bf16 operands to the MXU.
    ref_bf16 = jax.block_until_ready(
        mlp_reference(feature, params, filter_channels, res_layers,
                      dot_dtype=jnp.bfloat16))
    np.testing.assert_allclose(np.asarray(out), np.asarray(ref_bf16),
                               rtol=5e-3, atol=5e-3)

    # Loose sanity check vs. the full-f32 reference (bf16 MXU-input drift).
    ref_f32 = jax.block_until_ready(
        mlp_reference(feature, params, filter_channels, res_layers,
                      dot_dtype=jnp.float32))
    np.testing.assert_allclose(np.asarray(out), np.asarray(ref_f32),
                               rtol=5e-2, atol=5e-2)

    print("KERNEL_OK")
</pallas_src>

<mosaic_0001>
module attributes {stable_mosaic.version = 11 : i64} {
  func.func @_mlp_fused_kernel(%arg0: i32, %arg1: memref<1x16x256xf32, #tpu.memory_space<vmem>>, %arg2: memref<64x16xbf16, #tpu.memory_space<vmem>>, %arg3: memref<64x64xbf16, #tpu.memory_space<vmem>>, %arg4: memref<64x64xbf16, #tpu.memory_space<vmem>>, %arg5: memref<64x16xbf16, #tpu.memory_space<vmem>>, %arg6: memref<8x64xbf16, #tpu.memory_space<vmem>>, %arg7: memref<64x64xf32, #tpu.memory_space<vmem>>, %arg8: memref<64x8xf32, #tpu.memory_space<vmem>>, %arg9: memref<1x8x256xf32, #tpu.memory_space<vmem>>) attributes {dimension_semantics = [#tpu.dimension_semantics<parallel>], iteration_bounds = array<i64: 2>, scalar_prefetch = 0 : i64, scratch_operands = 0 : i64, tpu.core_type = #tpu.core_type<tc>, window_params = [{transform_indices = @transform_0, window_bounds = array<i64: 1, 16, 256>}, {pipeline_mode = #tpu.pipeline_mode<synchronous>, transform_indices = @transform_1, window_bounds = array<i64: 64, 16>}, {pipeline_mode = #tpu.pipeline_mode<synchronous>, transform_indices = @transform_2, window_bounds = array<i64: 64, 64>}, {pipeline_mode = #tpu.pipeline_mode<synchronous>, transform_indices = @transform_3, window_bounds = array<i64: 64, 64>}, {pipeline_mode = #tpu.pipeline_mode<synchronous>, transform_indices = @transform_4, window_bounds = array<i64: 64, 16>}, {pipeline_mode = #tpu.pipeline_mode<synchronous>, transform_indices = @transform_5, window_bounds = array<i64: 8, 64>}, {pipeline_mode = #tpu.pipeline_mode<synchronous>, transform_indices = @transform_6, window_bounds = array<i64: 64, 64>}, {pipeline_mode = #tpu.pipeline_mode<synchronous>, transform_indices = @transform_7, window_bounds = array<i64: 64, 8>}, {transform_indices = @transform_8, window_bounds = array<i64: 1, 8, 256>}]} {
    %c0 = arith.constant 0 : index
    %c0_0 = arith.constant 0 : index
    %c0_1 = arith.constant 0 : index
    %0 = vector.load %arg1[%c0, %c0_0, %c0_1] : memref<1x16x256xf32, #tpu.memory_space<vmem>>, vector<1x16x256xf32>
    %1 = vector.shape_cast %0 : vector<1x16x256xf32> to vector<16x256xf32>
    %2 = arith.truncf %1 : vector<16x256xf32> to vector<16x256xbf16>
    %c0_2 = arith.constant 0 : index
    %c0_3 = arith.constant 0 : index
    %3 = vector.load %arg7[%c0_2, %c0_3] : memref<64x64xf32, #tpu.memory_space<vmem>>, vector<64x64xf32>
    %c0_4 = arith.constant 0 : index
    %c0_5 = arith.constant 0 : index
    %4 = vector.load %arg8[%c0_4, %c0_5] : memref<64x8xf32, #tpu.memory_space<vmem>>, vector<64x8xf32>
    %c0_6 = arith.constant 0 : index
    %c0_7 = arith.constant 0 : index
    %5 = vector.load %arg2[%c0_6, %c0_7] : memref<64x16xbf16, #tpu.memory_space<vmem>>, vector<64x16xbf16>
    %cst = arith.constant dense<0.000000e+00> : vector<64x256xf32>
    %6 = tpu.matmul %5, %2, %cst {dimension_numbers = #tpu.dot_dimension_numbers<[1], [0], [0], [1], [0, 0, 1, 1], [], []>} : vector<64x16xbf16>, vector<16x256xbf16>, vector<64x256xf32> -> vector<64x256xf32>
    %7 = vector.extract_strided_slice %4 {offsets = [0, 0], sizes = [64, 1], strides = [1, 1]} : vector<64x8xf32> to vector<64x1xf32>
    %8 = vector.broadcast %7 : vector<64x1xf32> to vector<64x256xf32>
    %9 = arith.addf %6, %8 : vector<64x256xf32>
    %10 = vector.extract_strided_slice %4 {offsets = [0, 1], sizes = [64, 1], strides = [1, 1]} : vector<64x8xf32> to vector<64x1xf32>
    %11 = vector.extract_strided_slice %4 {offsets = [0, 2], sizes = [64, 1], strides = [1, 1]} : vector<64x8xf32> to vector<64x1xf32>
    %cst_8 = arith.constant dense<0.000000e+00> : vector<64xf32>
    %12 = vector.multi_reduction <add>, %9, %cst_8 [1] : vector<64x256xf32> to vector<64xf32>
    %13 = vector.shape_cast %12 : vector<64xf32> to vector<64x1xf32>
    %cst_9 = arith.constant dense<0.000000e+00> : vector<64x1xf32>
    %14 = tpu.matmul %3, %13, %cst_9 {dimension_numbers = #tpu.dot_dimension_numbers<[1], [0], [0], [1], [0, 0, 1, 1], [], []>} : vector<64x64xf32>, vector<64x1xf32>, vector<64x1xf32> -> vector<64x1xf32>
    %cst_10 = arith.constant 0.001953125 : f32
    %15 = vector.broadcast %cst_10 : f32 to vector<64x1xf32>
    %16 = arith.mulf %14, %15 : vector<64x1xf32>
    %17 = vector.broadcast %16 : vector<64x1xf32> to vector<64x256xf32>
    %18 = arith.subf %9, %17 : vector<64x256xf32>
    %19 = arith.mulf %18, %18 : vector<64x256xf32>
    %cst_11 = arith.constant dense<0.000000e+00> : vector<64xf32>
    %20 = vector.multi_reduction <add>, %19, %cst_11 [1] : vector<64x256xf32> to vector<64xf32>
    %21 = vector.shape_cast %20 : vector<64xf32> to vector<64x1xf32>
    %cst_12 = arith.constant dense<0.000000e+00> : vector<64x1xf32>
    %22 = tpu.matmul %3, %21, %cst_12 {dimension_numbers = #tpu.dot_dimension_numbers<[1], [0], [0], [1], [0, 0, 1, 1], [], []>} : vector<64x64xf32>, vector<64x1xf32>, vector<64x1xf32> -> vector<64x1xf32>
    %cst_13 = arith.constant 0.001953125 : f32
    %23 = vector.broadcast %cst_13 : f32 to vector<64x1xf32>
    %24 = arith.mulf %22, %23 : vector<64x1xf32>
    %cst_14 = arith.constant 9.99999974E-6 : f32
    %25 = vector.broadcast %cst_14 : f32 to vector<64x1xf32>
    %26 = arith.addf %24, %25 : vector<64x1xf32>
    %27 = math.rsqrt %26 : vector<64x1xf32>
    %28 = arith.mulf %10, %27 : vector<64x1xf32>
    %29 = vector.broadcast %28 : vector<64x1xf32> to vector<64x256xf32>
    %30 = arith.mulf %18, %29 : vector<64x256xf32>
    %31 = vector.broadcast %11 : vector<64x1xf32> to vector<64x256xf32>
    %32 = arith.addf %30, %31 : vector<64x256xf32>
    %33 = arith.negf %32 : vector<64x256xf32>
    %34 = math.exp %33 : vector<64x256xf32>
    %cst_15 = arith.constant 1.000000e+00 : f32
    %35 = vector.broadcast %cst_15 : f32 to vector<64x256xf32>
    %36 = arith.addf %35, %34 : vector<64x256xf32>
    %37 = arith.divf %35, %36 : vector<64x256xf32>
    %38 = arith.mulf %32, %37 : vector<64x256xf32>
    %c0_16 = arith.constant 0 : index
    %c0_17 = arith.constant 0 : index
    %39 = vector.load %arg3[%c0_16, %c0_17] : memref<64x64xbf16, #tpu.memory_space<vmem>>, vector<64x64xbf16>
    %40 = arith.truncf %38 : vector<64x256xf32> to vector<64x256xbf16>
    %cst_18 = arith.constant dense<0.000000e+00> : vector<64x256xf32>
    %41 = tpu.matmul %39, %40, %cst_18 {dimension_numbers = #tpu.dot_dimension_numbers<[1], [0], [0], [1], [0, 0, 1, 1], [], []>} : vector<64x64xbf16>, vector<64x256xbf16>, vector<64x256xf32> -> vector<64x256xf32>
    %42 = vector.extract_strided_slice %4 {offsets = [0, 3], sizes = [64, 1], strides = [1, 1]} : vector<64x8xf32> to vector<64x1xf32>
    %43 = vector.broadcast %42 : vector<64x1xf32> to vector<64x256xf32>
    %44 = arith.addf %41, %43 : vector<64x256xf32>
    %45 = vector.extract_strided_slice %4 {offsets = [0, 4], sizes = [64, 1], strides = [1, 1]} : vector<64x8xf32> to vector<64x1xf32>
    %46 = vector.extract_strided_slice %4 {offsets = [0, 5], sizes = [64, 1], strides = [1, 1]} : vector<64x8xf32> to vector<64x1xf32>
    %cst_19 = arith.constant dense<0.000000e+00> : vector<64xf32>
    %47 = vector.multi_reduction <add>, %44, %cst_19 [1] : vector<64x256xf32> to vector<64xf32>
    %48 = vector.shape_cast %47 : vector<64xf32> to vector<64x1xf32>
    %cst_20 = arith.constant dense<0.000000e+00> : vector<64x1xf32>
    %49 = tpu.matmul %3, %48, %cst_20 {dimension_numbers = #tpu.dot_dimension_numbers<[1], [0], [0], [1], [0, 0, 1, 1], [], []>} : vector<64x64xf32>, vector<64x1xf32>, vector<64x1xf32> -> vector<64x1xf32>
    %cst_21 = arith.constant 0.001953125 : f32
    %50 = vector.broadcast %cst_21 : f32 to vector<64x1xf32>
    %51 = arith.mulf %49, %50 : vector<64x1xf32>
    %52 = vector.broadcast %51 : vector<64x1xf32> to vector<64x256xf32>
    %53 = arith.subf %44, %52 : vector<64x256xf32>
    %54 = arith.mulf %53, %53 : vector<64x256xf32>
    %cst_22 = arith.constant dense<0.000000e+00> : vector<64xf32>
    %55 = vector.multi_reduction <add>, %54, %cst_22 [1] : vector<64x256xf32> to vector<64xf32>
    %56 = vector.shape_cast %55 : vector<64xf32> to vector<64x1xf32>
    %cst_23 = arith.constant dense<0.000000e+00> : vector<64x1xf32>
    %57 = tpu.matmul %3, %56, %cst_23 {dimension_numbers = #tpu.dot_dimension_numbers<[1], [0], [0], [1], [0, 0, 1, 1], [], []>} : vector<64x64xf32>, vector<64x1xf32>, vector<64x1xf32> -> vector<64x1xf32>
    %cst_24 = arith.constant 0.001953125 : f32
    %58 = vector.broadcast %cst_24 : f32 to vector<64x1xf32>
    %59 = arith.mulf %57, %58 : vector<64x1xf32>
    %cst_25 = arith.constant 9.99999974E-6 : f32
    %60 = vector.broadcast %cst_25 : f32 to vector<64x1xf32>
    %61 = arith.addf %59, %60 : vector<64x1xf32>
    %62 = math.rsqrt %61 : vector<64x1xf32>
    %63 = arith.mulf %45, %62 : vector<64x1xf32>
    %64 = vector.broadcast %63 : vector<64x1xf32> to vector<64x256xf32>
    %65 = arith.mulf %53, %64 : vector<64x256xf32>
    %66 = vector.broadcast %46 : vector<64x1xf32> to vector<64x256xf32>
    %67 = arith.addf %65, %66 : vector<64x256xf32>
    %68 = arith.negf %67 : vector<64x256xf32>
    %69 = math.exp %68 : vector<64x256xf32>
    %cst_26 = arith.constant 1.000000e+00 : f32
    %70 = vector.broadcast %cst_26 : f32 to vector<64x256xf32>
    %71 = arith.addf %70, %69 : vector<64x256xf32>
    %72 = arith.divf %70, %71 : vector<64x256xf32>
    %73 = arith.mulf %67, %72 : vector<64x256xf32>
    %c0_27 = arith.constant 0 : index
    %c0_28 = arith.constant 0 : index
    %74 = vector.load %arg4[%c0_27, %c0_28] : memref<64x64xbf16, #tpu.memory_space<vmem>>, vector<64x64xbf16>
    %75 = arith.truncf %73 : vector<64x256xf32> to vector<64x256xbf16>
    %cst_29 = arith.constant dense<0.000000e+00> : vector<64x256xf32>
    %76 = tpu.matmul %74, %75, %cst_29 {dimension_numbers = #tpu.dot_dimension_numbers<[1], [0], [0], [1], [0, 0, 1, 1], [], []>} : vector<64x64xbf16>, vector<64x256xbf16>, vector<64x256xf32> -> vector<64x256xf32>
    %c0_30 = arith.constant 0 : index
    %c0_31 = arith.constant 0 : index
    %77 = vector.load %arg5[%c0_30, %c0_31] : memref<64x16xbf16, #tpu.memory_space<vmem>>, vector<64x16xbf16>
    %cst_32 = arith.constant dense<0.000000e+00> : vector<64x256xf32>
    %78 = tpu.matmul %77, %2, %cst_32 {dimension_numbers = #tpu.dot_dimension_numbers<[1], [0], [0], [1], [0, 0, 1, 1], [], []>} : vector<64x16xbf16>, vector<16x256xbf16>, vector<64x256xf32> -> vector<64x256xf32>
    %79 = arith.addf %76, %78 : vector<64x256xf32>
    %80 = vector.extract_strided_slice %4 {offsets = [0, 6], sizes = [64, 1], strides = [1, 1]} : vector<64x8xf32> to vector<64x1xf32>
    %81 = vector.broadcast %80 : vector<64x1xf32> to vector<64x256xf32>
    %82 = arith.addf %79, %81 : vector<64x256xf32>
    %c0_33 = arith.constant 0 : index
    %c0_34 = arith.constant 0 : index
    %83 = vector.load %arg6[%c0_33, %c0_34] : memref<8x64xbf16, #tpu.memory_space<vmem>>, vector<8x64xbf16>
    %84 = arith.truncf %82 : vector<64x256xf32> to vector<64x256xbf16>
    %cst_35 = arith.constant dense<0.000000e+00> : vector<8x256xf32>
    %85 = tpu.matmul %83, %84, %cst_35 {dimension_numbers = #tpu.dot_dimension_numbers<[1], [0], [0], [1], [0, 0, 1, 1], [], []>} : vector<8x64xbf16>, vector<64x256xbf16>, vector<8x256xf32> -> vector<8x256xf32>
    %86 = vector.extract_strided_slice %4 {offsets = [0, 7], sizes = [8, 1], strides = [1, 1]} : vector<64x8xf32> to vector<8x1xf32>
    %87 = vector.broadcast %86 : vector<8x1xf32> to vector<8x256xf32>
    %88 = arith.addf %85, %87 : vector<8x256xf32>
    %cst_36 = arith.constant 0.000000e+00 : f32
    %89 = vector.broadcast %cst_36 : f32 to vector<8x256xf32>
    %90 = arith.addf %88, %89 : vector<8x256xf32>
    %cst_37 = arith.constant 1.000000e+00 : f32
    %91 = vector.broadcast %cst_37 : f32 to vector<8x256xf32>
    %92 = arith.mulf %91, %90 : vector<8x256xf32>
    %c0_38 = arith.constant 0 : index
    %c0_39 = arith.constant 0 : index
    %c0_40 = arith.constant 0 : index
    %93 = vector.load %arg9[%c0_38, %c0_39, %c0_40] : memref<1x8x256xf32, #tpu.memory_space<vmem>>, vector<1x8x256xf32>
    %94 = vector.shape_cast %93 : vector<1x8x256xf32> to vector<8x256xf32>
    %95 = vector.shape_cast %92 : vector<8x256xf32> to vector<1x8x256xf32>
    tpu.vector_store %arg9[%c0_38, %c0_39, %c0_40], %95 {strides = array<i32>} : memref<1x8x256xf32, #tpu.memory_space<vmem>>, vector<1x8x256xf32>,
    return
  }
  func.func @transform_0(%arg0: i32) -> (i32, i32, i32) {
    %c0_i32 = arith.constant 0 : i32
    %c0_i32_0 = arith.constant 0 : i32
    %c0_i32_1 = arith.constant 0 : i32
    return %arg0, %c0_i32, %c0_i32_0 : i32, i32, i32
  }
  func.func @transform_1(%arg0: i32) -> (i32, i32) {
    %c0_i32 = arith.constant 0 : i32
    %c0_i32_0 = arith.constant 0 : i32
    %c0_i32_1 = arith.constant 0 : i32
    return %c0_i32, %c0_i32_0 : i32, i32
  }
  func.func @transform_2(%arg0: i32) -> (i32, i32) {
    %c0_i32 = arith.constant 0 : i32
    %c0_i32_0 = arith.constant 0 : i32
    %c0_i32_1 = arith.constant 0 : i32
    return %c0_i32, %c0_i32_0 : i32, i32
  }
  func.func @transform_3(%arg0: i32) -> (i32, i32) {
    %c0_i32 = arith.constant 0 : i32
    %c0_i32_0 = arith.constant 0 : i32
    %c0_i32_1 = arith.constant 0 : i32
    return %c0_i32, %c0_i32_0 : i32, i32
  }
  func.func @transform_4(%arg0: i32) -> (i32, i32) {
    %c0_i32 = arith.constant 0 : i32
    %c0_i32_0 = arith.constant 0 : i32
    %c0_i32_1 = arith.constant 0 : i32
    return %c0_i32, %c0_i32_0 : i32, i32
  }
  func.func @transform_5(%arg0: i32) -> (i32, i32) {
    %c0_i32 = arith.constant 0 : i32
    %c0_i32_0 = arith.constant 0 : i32
    %c0_i32_1 = arith.constant 0 : i32
    return %c0_i32, %c0_i32_0 : i32, i32
  }
  func.func @transform_6(%arg0: i32) -> (i32, i32) {
    %c0_i32 = arith.constant 0 : i32
    %c0_i32_0 = arith.constant 0 : i32
    %c0_i32_1 = arith.constant 0 : i32
    return %c0_i32, %c0_i32_0 : i32, i32
  }
  func.func @transform_7(%arg0: i32) -> (i32, i32) {
    %c0_i32 = arith.constant 0 : i32
    %c0_i32_0 = arith.constant 0 : i32
    %c0_i32_1 = arith.constant 0 : i32
    return %c0_i32, %c0_i32_0 : i32, i32
  }
  func.func @transform_8(%arg0: i32) -> (i32, i32, i32) {
    %c0_i32 = arith.constant 0 : i32
    %c0_i32_0 = arith.constant 0 : i32
    %c0_i32_1 = arith.constant 0 : i32
    return %arg0, %c0_i32, %c0_i32_0 : i32, i32, i32
  }
}

</mosaic_0001>

<bundles_post_ra>
// kernel: tpu_custom_call.1
= control target key start
LH: loop header
LB: loop body
LE: loop exit
PB: predicated region body
PF: predicated region fallthrough
CT: control target
= control target key end

     0   :  { %13 = vsyncpa [#allocation3], 0  ;;  %s4109_s0 = inlined_call_operand.vmem [shape: f32[2,16,256], index: 0, kind: input, shape index: {}]   ;;  %s4110_s1 = inlined_call_operand.vmem [shape: bf16[64,16], index: 1, kind: input, shape index: {}]   ;;  %s4111_s2 = inlined_call_operand.hbm [shape: bf16[64,64], index: 2, kind: input, shape index: {}]   ;;  %s4112_s3 = inlined_call_operand.vmem [shape: bf16[64,64], index: 3, kind: input, shape index: {}]   ;;  %s4113_s4 = inlined_call_operand.vmem [shape: bf16[64,16], index: 4, kind: input, shape index: {}]   ;;  %s4114_s5 = inlined_call_operand.hbm [shape: bf16[8,64], index: 5, kind: input, shape index: {}]   ;;  %s4115_s6 = inlined_call_operand.vmem [shape: f32[64,64], index: 6, kind: input, shape index: {}]   ;;  %s4116_s7 = inlined_call_operand.vmem [shape: f32[64,8], index: 7, kind: input, shape index: {}]   ;;  %s4117_s8 = inlined_call_operand.hbm [shape: f32[2,8,256], index: 8, kind: output, shape index: {}]  }
   0x1   :  { %14 = vsyncpa [#allocation6], 0 }
   0x2   :  { %15 = vsyncpa [#allocation4], 0 }
   0x3   :  { %17 = vsyncpa [#allocation4 + $0x1], 0  ;;  %s3208_s27 = smov 0   ;;  %s3210_s28 = smov 0  }
   0x4   :  { %s3212_s29 = smov 0   ;;  %s3214_s30 = smov 0  }
   0x5 LB: > { %4122 = sst [smem:[#allocation11_spill]] %s3142_s29  ;;  %s3229_s9 = sadd.s32 4294967295, %s3146_s30   ;;  %s3146_s30 = sphi %s3214_s30, %s4139_s30   ;;  %s3142_s29 = sphi %s3212_s29, %s4136_s29   ;;  %s3138_s28 = sphi %s3210_s28, %s4138_s28   ;;  %s3134_s27 = sphi %s3208_s27, %s4137_s27  }
   0x6   : > { %s2362_s10 = sadd.s32 4294967294, %s3146_s30   ;;  %s3233_s11 = sadd.s32 1, %s3146_s30  }
   0x7   : > { %s203_s12 = sadd.s32 1, %s3142_s29  ;;  %s200_s13 = ssub.s32 %s3146_s30, %s3233_s11 }
   0x8   : > { %p213_p0 = scmp.ne.s32.totalorder %s3142_s29, %s3138_s28  ;;  %p201_p1 = scmp.eq.s32.totalorder %s200_s13, 0 }
   0x9   : > { %p214_p2 = scmp.eq.s32.totalorder %s3229_s9, 1  ;;  %p219_p3 = scmp.ne.s32.totalorder %s3138_s28, %s3134_s27 }
   0xa   : > { %p220_p4 = scmp.eq.s32.totalorder %s2362_s10, 1  ;;  %p2363_p7 = scmp.ge.s32.totalorder %s3146_s30, 1 }
   0xb   : > { %s3244_s14 = scalar_select %p201_p1, %s3142_s29, %s203_s12  }
   0xc   : > { %p3246_p5 = por %p214_p2, %p213_p0  ;;  %p3250_p6 = por %p220_p4, %p219_p3 }
   0xd   : > { %4123 = sst [smem:[#allocation12_spill]] %s3244_s14  ;;  %p227_p8 = scmp.lt.s32.totalorder %s3146_s30, 3 }
   0xe   : > { %s4124_s15 = scalar_select %p3246_p5, 1, 0 }
   0xf   : > { %s4125_s16 = scalar_select %p3250_p6, 1, 0 }
  0x10   : > { %p4118_p9 = scmp.eq.s32.totalorder %s3229_s9, 0  ;;  %p3257_p10 = pnand %p2363_p7, %p227_p8 }
  0x11   : > { %s3148_s18 = smov [#allocation2]   ;;  %s3149_s21 = smov [#allocation5]  }
  0x12   : > { %s4126_s17 = scalar_select %p3257_p10, 1, 0 }
  0x13   : > { %s242_s19 = sshll.u32 %s3148_s18, 4  ;;  %p2743_p11 = pneg %p3257_p10  ;;  %s243_s19 = int_to_ptr.vmem [resolvable:$true] %s242_s19 }
  0x14   : > { %s262_s22 = sshll.u32 %s3149_s21, 4  ;;  %s3020_s25 = scalar_lea.hbm %s4111_s2, 512  ;;  %s3269_s22 = int_to_ptr.vmem [resolvable:$true] %s262_s22 }
  0x15   : > { %p3265_p12 = pnand %p4118_p9, %p2743_p11  ;;  %p3021_p13 = scmp.ne.s32.totalorder %s4111_s2, %s3020_s25 }
  0x16   : > { %p3027_p3 = scmp.lt.u32.totalorder %s3020_s25, %s4111_s2 }
  0x17   : > { %p3022_p0 = pneg %p3265_p12 }
  0x19   : > { %p3023_p1 = pnand %p3022_p0, %p3021_p13 }
  0x1b   : > { %p3024_p2 = pneg %p3023_p1 }
  0x1d   : > { %p3029_p4 = pnand %p3027_p3, %p3024_p2 }
  0x1f   : > { %3032 = shalt.err (!%p3029_p4)
}
  0x20   : > { %s3033_s18 = scalar_lea.vmem %s243_s19, 512  ;;  %p3041_p9 = scmp.lt.s32.totalorder %s243_s19, %s243_s19 }
  0x21   : > { %p3034_p7 = scmp.ne.s32.totalorder %s243_s19, %s3033_s18  ;;  %p3042_p6 = scmp.lt.s32.totalorder %s3033_s18, %s3033_s18 }
  0x23   : > { %p3036_p8 = pnand %p3034_p7, %p3022_p0  ;;  %p3043_p5 = por %p3042_p6, %p3041_p9 }
  0x25   : > { %p3037_p11 = pneg %p3036_p8 }
  0x27   : > { %p3044_p10 = pnand %p3043_p5, %p3037_p11 }
  0x29   : > { %3047 = shalt.err (!%p3044_p10)
}
  0x2a   : > { %s3150_s21 = smov 64   ;;  %s3151_s23 = smov 4  }
  0x2b   : > { %2746 = dma.hbm_to_vmem [thread:$0]  (!%p3265_p12), %s4111_s2, 512, %s243_s19, [#allocation3], %s3150_s21, %s3150_s21, %s3151_s23  }
  0x2c   : > { %s3048_s12 = scalar_lea.hbm %s4114_s5, 64 }
  0x2d   : > { %p3049_p13 = scmp.ne.s32.totalorder %s4114_s5, %s3048_s12  ;;  %p3055_p9 = scmp.lt.u32.totalorder %s3048_s12, %s4114_s5 }
  0x2f   : > { %p3051_p5 = pnand %p3049_p13, %p3022_p0 }
  0x31   : > { %p3052_p6 = pneg %p3051_p5 }
  0x33   : > { %p3057_p10 = pnand %p3055_p9, %p3052_p6 }
  0x35   : > { %3060 = shalt.err (!%p3057_p10)
}
  0x36   : > { %s3061_s19 = scalar_lea.vmem %s3269_s22, 64  ;;  %p3069_p4 = scmp.lt.s32.totalorder %s3269_s22, %s3269_s22 }
  0x37   : > { %p3062_p1 = scmp.ne.s32.totalorder %s3269_s22, %s3061_s19  ;;  %p3070_p7 = scmp.lt.s32.totalorder %s3061_s19, %s3061_s19 }
  0x39   : > { %p3064_p2 = pnand %p3062_p1, %p3022_p0  ;;  %p3071_p8 = por %p3070_p7, %p3069_p4 }
  0x3b   : > { %p3065_p3 = pneg %p3064_p2 }
  0x3d   : > { %p3072_p11 = pnand %p3071_p8, %p3065_p3 }
  0x3f   : > { %3075 = shalt.err (!%p3072_p11)
}
  0x40   : > { %2749 = dma.hbm_to_vmem [thread:$0]  (!%p3265_p12), %s4114_s5, 64, %s3269_s22, [#allocation6]  }
  0x41   : > { %p4128_p13 = scmp.ne.s32.totalorder %s4126_s17, 0 }
  0x42   : > { %p4129_p5 = scmp.eq.s32.totalorder (!%p4128_p13), %s3229_s9, 0 }
  0x43   : > { %289 = sbr.rel (%p4128_p13) target bundleno = 3458 (0xd82), region = 52 }
  0x4a   : > { %3121 = dma.done.wait (%p4129_p5), [#allocation3], 512   ;;  %p4130_p0 = pmov %p4129_p5 }
  0x4c   : > { %3123 = vsyncadd (%p4130_p0), [#allocation3], 4294966784  ;;  %p4131_p6 = pmov %p4130_p0 }
  0x4d   : > { %p4132_p9 = pmov %p4130_p0 }
  0x4e   : > { %3125 = dma.done.wait (%p4131_p6), [#allocation6], 64  }
  0x4f   : > { %3127 = vsyncadd (%p4132_p9), [#allocation6], 4294967232  ;;  %p327_p10 = scmp.lt.s32.totalorder %s3229_s9, 1  ;;  %v3152_v0 = vmov 0   ;;  %v2828_v7 = vld [vmem:[%s4110_s1] sm:$0xff]   ;;  %vm423_vm0 = vcmask 130048  }
  0x50   : > { %468 = vmatprep.mubr.bf16.mxu1 %v3152_v0  ;;  %2805 = vset.pattern.permute.xlu0 %v3152_v0  ;;  %v3349_v8 = vld [vmem:[%s4116_s7] sm:$0xff]  ;;  %v3355_v9 = vld [vmem:[%s4116_s7 + $0x10] sm:$0xff]  ;;  %v3361_v10 = vld [vmem:[%s4116_s7 + $0x8] sm:$0xff]  ;;  %vm533_vm1 = vcmask 523264   ;;  %s3158_s22 = smov 4   ;;  %s324_s24 = sand.u32 1, %s3138_s28  }
  0x51   : > { %s328_s17 = scalar_select %p327_p10, %s3229_s9, 1  ;;  %2806 = vset.pattern.permute.xlu1 %v3152_v0  ;;  %1264 = vmatprep.mubr.bf16.mxu0 %v3152_v0  ;;  %v3367_v11 = vld [vmem:[%s4116_s7 + $0x18] sm:$0xff]  ;;  %v2829_v12 = vld [vmem:[%s4110_s1 + $0x8] sm:$0xff]   ;;  %v3376_v13 = vld [vmem:[%s4116_s7 + $0x20] sm:$0xff] }
  0x52   : > { %365 = vperm.xlu0 %2805, %v3349_v8   ;;  %375 = vperm.xlu1 %2806, %v3355_v9   ;;  %v3382_v14 = vld [vmem:[%s4116_s7 + $0x28] sm:$0xff]  ;;  %v3388_v15 = vld [vmem:[%s4116_s7 + $0x30] sm:$0xff]  ;;  %v3397_v16 = vld [vmem:[%s4116_s7 + $0x38] sm:$0xff]  ;;  %s2370_s25 = sshll.u32 %s324_s24, 4  ;;  %s2476_s26 = sshll.u32 %s3229_s9, 8 }
  0x53   : > { %s2475_s20 = sshll.u32 %s328_s17, 5  ;;  %v2830_v17 = vld [vmem:[%s4110_s1 + $0x10] sm:$0xff]   ;;  %v2831_v18 = vld [vmem:[%s4110_s1 + $0x18] sm:$0xff]   ;;  %s3154_s17 = smov 1  }
  0x54   : > { %s331_s23 = scalar_lea.vmem %s4109_s0, %s2475_s20  ;;  %s326_s10 = scalar_lea.vmem [#allocation7], %s2370_s25 }
  0x55   : > { %v334_v1 = vld [vmem:[%s331_s23 + $0x8] sm:$0xff]  ;;  %v336_v2 = vld [vmem:[%s331_s23 + $0x18] sm:$0xff]  ;;  %v333_v3 = vld [vmem:[%s331_s23] sm:$0xff]  ;;  %s2281_s12 = sshll.u32 %s326_s10, 4  ;;  %s4067_s19 = scalar_lea.hbm %s4117_s8, %s2476_s26  ;;  %s4069_s12 = int_to_ptr.vmem [resolvable:$true] %s2281_s12 }
  0x56   : > { %v3337_v4 = vpack.c.bf16 %v336_v2, %v334_v1  ;;  %v335_v5 = vld [vmem:[%s331_s23 + $0x10] sm:$0xff]  ;;  %370 = vperm.xlu0 %2805, %v3361_v10   ;;  %380 = vperm.xlu1 %2806, %v3367_v11   ;;  %s2267_s9 = scalar_lea.sflag [#allocation4], %s324_s24  ;;  %s3076_s29 = scalar_lea.vmem %s4069_s12, 256 }
  0x57   : > { %v3339_v6 = vpack.c.bf16 %v335_v5, %v333_v3  ;;  %v3461_v5 = vld [vmem:[%s4115_s6] sm:$0xff]  ;;  %p3077_p12 = scmp.ne.s32.totalorder %s4069_s12, %s3076_s29  ;;  %p4133_p1 = scmp.ne.s32.totalorder %s4124_s15, 0 }
  0x58   : > { %436 = vmatprep.subr.bf16.mxu1 %v3337_v4  ;;  %s3162_s14 = smov [#allocation7]  }
  0x59   : > { %437 = vmatpush1.bf16.msra.mxu1 %v3339_v6  ;;  %p3078_p2 = pnand %p3077_p12, %p4133_p1 }
  0x5a   : > { %385 = vperm.xlu0 %2805, %v3376_v13   ;;  %390 = vperm.xlu1 %2806, %v3382_v14  }
  0x5b   : > { %p3079_p3 = pneg %p3078_p2 }
  0x5c   : > { %2377 = vmatmul.mubr.msk.bf16.vlgmr.msra.gmra.mrb[0].mxu1 %vm423_vm0, %v2828_v7 }
  0x5d   : > { %478 = vmatprep.mubr.bf16.mxu1 %v3152_v0 }
  0x5e   : > { %395 = vperm.xlu0 %2805, %v3388_v15   ;;  %400 = vperm.xlu1 %2806, %v3397_v16  }
  0x64   : > { %2378 = vmatmul.mubr.msk.bf16.gmra.mrb[4].mxu1 %vm423_vm0, %v2829_v12 }
  0x65   : > { %488 = vmatprep.mubr.bf16.mxu1 %v3152_v0 }
  0x6c   : > { %2379 = vmatmul.mubr.msk.bf16.gmra.mrb[8].mxu1 %vm423_vm0, %v2830_v17 }
  0x6d   : > { %498 = vmatprep.mubr.bf16.mxu1 %v3152_v0 }
  0x74   : > { %2380 = vmatmul.mubr.msk.bf16.gmra.mrb[12].mxu1 %vm423_vm0, %v2831_v18 }
  0x75   : > { %2557 = vmatprep.mubr.msk.f32.mxu1 %vm533_vm1, %v3461_v5 }
  0xd1   : > { %v366_v19 = vpop.permute.xlu0 %365  ;;  %v376_v30 = vpop.permute.xlu1 %375 }
  0xd5   : > { %v371_v20 = vpop.permute.xlu0 %370  ;;  %v381_v37 = vpop.permute.xlu1 %380 }
  0xd9   : > { %v386_v42 = vpop.permute.xlu0 %385  ;;  %v391_v47 = vpop.permute.xlu1 %390 }
  0xdd   : > { %v396_v55 = vpop.permute.xlu0 %395  ;;  %v401_v59 = vpop.permute.xlu1 %400 }
 0x12f   : > { %v470_v21 = vpop.f32.mrb[0].mxu1 }
 0x130   : > { %v3410_v22 = vadd.f32 %v470_v21, %v366_v19  ;;  %v472_v23 = vpop.f32.mrb[1].mxu1 }
 0x131   : > { %v3412_v24 = vadd.f32 %v472_v23, %v366_v19  ;;  %v474_v25 = vpop.f32.mrb[2].mxu1 }
 0x132   : > { %v3414_v26 = vadd.f32 %v474_v25, %v371_v20  ;;  %v476_v27 = vpop.f32.mrb[3].mxu1 }
 0x133   : > { %v3416_v28 = vadd.f32 %v476_v27, %v371_v20  ;;  %v509_v29 = vadd.f32 %v3412_v24, %v3410_v22 }
 0x135   : > { %510 = vadd.xlane.f32.xlu0 %v509_v29  ;;  %v512_v31 = vadd.f32 %v3416_v28, %v3414_v26 }
 0x137   : > { %v480_v32 = vpop.f32.mrb[4].mxu1  ;;  %513 = vadd.xlane.f32.xlu1 %v512_v31  ;;  %v3468_v31 = vld [vmem:[%s4115_s6 + $0x8] sm:$0xff] }
 0x138   : > { %v3422_v33 = vadd.f32 %v480_v32, %v376_v30  ;;  %v482_v34 = vpop.f32.mrb[5].mxu1  ;;  %v3473_v32 = vld [vmem:[%s4115_s6 + $0x10] sm:$0xff] }
 0x139   : > { %v3424_v35 = vadd.f32 %v482_v34, %v376_v30  ;;  %v484_v36 = vpop.f32.mrb[6].mxu1  ;;  %v3482_v34 = vld [vmem:[%s4115_s6 + $0x18] sm:$0xff] }
 0x13a   : > { %v486_v38 = vpop.f32.mrb[7].mxu1  ;;  %v3426_v39 = vadd.f32 %v484_v36, %v381_v37  ;;  %v3487_v36 = vld [vmem:[%s4115_s6 + $0x20] sm:$0xff] }
 0x13b   : > { %v3428_v40 = vadd.f32 %v486_v38, %v381_v37  ;;  %v515_v41 = vadd.f32 %v3424_v35, %v3422_v33  ;;  %v3496_v37 = vld [vmem:[%s4115_s6 + $0x28] sm:$0xff]  ;;  %v3501_v38 = vld [vmem:[%s4115_s6 + $0x30] sm:$0xff] }
 0x13d   : > { %516 = vadd.xlane.f32.xlu0 %v515_v41  ;;  %v518_v44 = vadd.f32 %v3428_v40, %v3426_v39  ;;  %v3510_v41 = vld [vmem:[%s4115_s6 + $0x38] sm:$0xff] }
 0x13f   : > { %v490_v43 = vpop.f32.mrb[8].mxu1 }
 0x140   : > { %v3434_v45 = vadd.f32 %v490_v43, %v386_v42  ;;  %v492_v46 = vpop.f32.mrb[9].mxu1 }
 0x141   : > { %v3436_v48 = vadd.f32 %v492_v46, %v386_v42  ;;  %v494_v49 = vpop.f32.mrb[10].mxu1  ;;  %519 = vadd.xlane.f32.xlu0 %v518_v44 }
 0x142   : > { %v3438_v50 = vadd.f32 %v494_v49, %v391_v47  ;;  %v496_v51 = vpop.f32.mrb[11].mxu1 }
 0x143   : > { %v3440_v52 = vadd.f32 %v496_v51, %v391_v47  ;;  %v521_v53 = vadd.f32 %v3436_v48, %v3434_v45 }
 0x145   : > { %522 = vadd.xlane.f32.xlu1 %v521_v53  ;;  %v524_v54 = vadd.f32 %v3440_v52, %v3438_v50 }
 0x147   : > { %v500_v56 = vpop.f32.mrb[12].mxu1  ;;  %525 = vadd.xlane.f32.xlu0 %v524_v54 }
 0x148   : > { %v3446_v57 = vadd.f32 %v500_v56, %v396_v55  ;;  %v502_v58 = vpop.f32.mrb[13].mxu1 }
 0x149   : > { %v3448_v60 = vadd.f32 %v502_v58, %v396_v55  ;;  %v504_v61 = vpop.f32.mrb[14].mxu1 }
 0x14a   : > { %v3450_v62 = vadd.f32 %v504_v61, %v401_v59  ;;  %v506_v63 = vpop.f32.mrb[15].mxu1 }
 0x14b   : > { %v3452_v1 = vadd.f32 %v506_v63, %v401_v59  ;;  %v527_v2 = vadd.f32 %v3448_v60, %v3446_v57 }
 0x14d   : > { %528 = vadd.xlane.f32.xlu1 %v527_v2  ;;  %v530_v3 = vadd.f32 %v3452_v1, %v3450_v62 }
 0x14f   : > { %531 = vadd.xlane.f32.xlu0 %v530_v3 }
 0x1c2   : > { %v511_v7 = vpop.xlane.xlu0 %510 }
 0x1c4   : > { %v514_v12 = vpop.xlane.xlu1 %513 }
 0x1c5   : > { %v2653_v17 = vpack.c.bf16 %v514_v12, %v511_v7 }
 0x1c7   : > { %2654 = vmatprep.subr.bf16.mxu1 %v2653_v17 }
 0x1c8   : > { %2656 = vmatpush3.bf16.msra.mxu1 %v2653_v17 }
 0x1ca   : > { %v517_v18 = vpop.xlane.xlu0 %516 }
 0x1ce   : > { %v520_v19 = vpop.xlane.xlu0 %519 }
 0x1cf   : > { %v2657_v20 = vpack.c.bf16 %v520_v19, %v517_v18 }
 0x1d1   : > { %2658 = vmatprep.subr.bf16.mxu1 %v2657_v20 }
 0x1d2   : > { %2660 = vmatpush3.bf16.msra.mxu1 %v2657_v20  ;;  %v523_v21 = vpop.xlane.xlu1 %522 }
 0x1d4   : > { %v526_v23 = vpop.xlane.xlu0 %525 }
 0x1d5   : > { %v2661_v25 = vpack.c.bf16 %v526_v23, %v523_v21 }
 0x1d7   : > { %2662 = vmatprep.subr.bf16.mxu1 %v2661_v25 }
 0x1d8   : > { %2664 = vmatpush3.bf16.msra.mxu1 %v2661_v25 }
 0x1da   : > { %v529_v27 = vpop.xlane.xlu1 %528 }
 0x1dc   : > { %v532_v29 = vpop.xlane.xlu0 %531 }
 0x1dd   : > { %v2665_v30 = vpack.c.bf16 %v532_v29, %v529_v27 }
 0x1df   : > { %2666 = vmatprep.subr.bf16.mxu1 %v2665_v30 }
 0x1e0   : > { %2668 = vmatpush3.bf16.msra.mxu1 %v2665_v30 }
 0x1e3   : > { %2558 = vmatmul.mubr.msk.f32.vlgmr.msra.gmra.mrb[16].mxu1 %vm533_vm1, %v3468_v31 }
 0x1e4   : > { %2560 = vmatprep.mubr.msk.f32.mxu1 %vm533_vm1, %v3473_v32 }
 0x1e7   : > { %2561 = vmatmul.mubr.msk.f32.gmra.mrb[18].mxu1 %vm533_vm1, %v3482_v34 }
 0x1e8   : > { %2563 = vmatprep.mubr.msk.f32.mxu1 %vm533_vm1, %v3487_v36 }
 0x1eb   : > { %2564 = vmatmul.mubr.msk.f32.gmra.mrb[20].mxu1 %vm533_vm1, %v3496_v37 }
 0x1ec   : > { %2566 = vmatprep.mubr.msk.f32.mxu1 %vm533_vm1, %v3501_v38 }
 0x1ef   : > { %2567 = vmatmul.mubr.msk.f32.gmra.mrb[22].mxu1 %vm533_vm1, %v3510_v41 }
 0x1f0   : > { %2585 = vmatprep.mubr.msk.f32.mxu1 %vm533_vm1, %v3461_v5 }
 0x2b6   : > { %v2559_v42 = vpop.f32.mrb[16].mxu1 }
 0x2b7   : > { %v664_v43 = vmul.f32 0.001953125, %v2559_v42  ;;  %v624_v44 = vpop.f32.mrb[17].mxu1 }
 0x2b8   : > { %v663_v46 = vmul.f32 0.001953125, %v624_v44 }
 0x2b9   : > { %678 = vperm.xlu0 %2805, %v664_v43  }
 0x2ba   : > { %673 = vperm.xlu1 %2806, %v663_v46   ;;  %v2562_v47 = vpop.f32.mrb[18].mxu1 }
 0x2bb   : > { %v666_v49 = vmul.f32 0.001953125, %v2562_v47  ;;  %v634_v51 = vpop.f32.mrb[19].mxu1 }
 0x2bc   : > { %v665_v55 = vmul.f32 0.001953125, %v634_v51 }
 0x2be   : > { %688 = vperm.xlu1 %2806, %v666_v49   ;;  %v2565_v53 = vpop.f32.mrb[20].mxu1 }
 0x2bf   : > { %v644_v54 = vpop.f32.mrb[21].mxu1  ;;  %v668_v58 = vmul.f32 0.001953125, %v2565_v53 }
 0x2c0   : > { %v667_v56 = vmul.f32 0.001953125, %v644_v54 }
 0x2c2   : > { %683 = vperm.xlu1 %2806, %v665_v55   ;;  %693 = vperm.xlu0 %2805, %v667_v56   ;;  %v2568_v59 = vpop.f32.mrb[22].mxu1 }
 0x2c3   : > { %v654_v61 = vpop.f32.mrb[23].mxu1  ;;  %v670_v2 = vmul.f32 0.001953125, %v2568_v59 }
 0x2c4   : > { %v669_v63 = vmul.f32 0.001953125, %v654_v61 }
 0x2c6   : > { %698 = vperm.xlu1 %2806, %v668_v58   ;;  %703 = vperm.xlu0 %2805, %v669_v63  }
 0x2ca   : > { %708 = vperm.xlu1 %2806, %v670_v2  }
 0x338   : > { %v679_v3 = vpop.permute.xlu0 %678 }
 0x339   : > { %v3517_v7 = vsub.f32 %v3414_v26, %v679_v3  ;;  %v3520_v12 = vsub.f32 %v3416_v28, %v679_v3  ;;  %v674_v17 = vpop.permute.xlu1 %673 }
 0x33a   : > { %v3523_v18 = vsub.f32 %v3410_v22, %v674_v17  ;;  %v3526_v19 = vsub.f32 %v3412_v24, %v674_v17 }
 0x33b   : > { %v729_v20 = vmul.f32 %v3517_v7, %v3517_v7  ;;  %v730_v21 = vmul.f32 %v3520_v12, %v3520_v12 }
 0x33c   : > { %v727_v26 = vmul.f32 %v3523_v18, %v3523_v18  ;;  %v728_v28 = vmul.f32 %v3526_v19, %v3526_v19 }
 0x33d   : > { %v689_v23 = vpop.permute.xlu1 %688  ;;  %v746_v25 = vadd.f32 %v730_v21, %v729_v20 }
 0x33e   : > { %v3537_v22 = vsub.f32 %v3426_v39, %v689_v23  ;;  %v3540_v24 = vsub.f32 %v3428_v40, %v689_v23  ;;  %v743_v27 = vadd.f32 %v728_v28, %v727_v26 }
 0x33f   : > { %747 = vadd.xlane.f32.xlu1 %v746_v25 }
 0x340   : > { %744 = vadd.xlane.f32.xlu0 %v743_v27  ;;  %v733_v29 = vmul.f32 %v3537_v22, %v3537_v22  ;;  %v734_v30 = vmul.f32 %v3540_v24, %v3540_v24 }
 0x341   : > { %v684_v42 = vpop.permute.xlu1 %683  ;;  %v694_v43 = vpop.permute.xlu0 %693 }
 0x342   : > { %v3547_v44 = vsub.f32 %v3422_v33, %v684_v42  ;;  %v3550_v39 = vsub.f32 %v3424_v35, %v684_v42  ;;  %v3553_v40 = vsub.f32 %v3434_v45, %v694_v43  ;;  %v3556_v46 = vsub.f32 %v3436_v48, %v694_v43 }
 0x343   : > { %v752_v47 = vadd.f32 %v734_v30, %v733_v29 }
 0x344   : > { %v735_v49 = vmul.f32 %v3553_v40, %v3553_v40  ;;  %v736_v51 = vmul.f32 %v3556_v46, %v3556_v46  ;;  %v731_v33 = vmul.f32 %v3547_v44, %v3547_v44  ;;  %v732_v35 = vmul.f32 %v3550_v39, %v3550_v39 }
 0x345   : > { %753 = vadd.xlane.f32.xlu0 %v752_v47  ;;  %v699_v53 = vpop.permute.xlu1 %698  ;;  %v704_v45 = vpop.permute.xlu0 %703 }
 0x346   : > { %v3567_v54 = vsub.f32 %v3438_v50, %v699_v53  ;;  %v3570_v48 = vsub.f32 %v3440_v52, %v699_v53  ;;  %v3573_v55 = vsub.f32 %v3446_v57, %v704_v45  ;;  %v3576_v56 = vsub.f32 %v3448_v60, %v704_v45 }
 0x347   : > { %v755_v58 = vadd.f32 %v736_v51, %v735_v49  ;;  %v749_v59 = vadd.f32 %v732_v35, %v731_v33  ;;  %v3153_v51 = vmov 2  }
 0x348   : > { %v737_v61 = vmul.f32 %v3567_v54, %v3567_v54  ;;  %v738_v63 = vmul.f32 %v3570_v48, %v3570_v48  ;;  %v739_v50 = vmul.f32 %v3573_v55, %v3573_v55  ;;  %v740_v52 = vmul.f32 %v3576_v56, %v3576_v56  ;;  %2807 = vset.pattern.permute.xlu1 %v3153_v51 }
 0x349   : > { %756 = vadd.xlane.f32.xlu1 %v755_v58  ;;  %750 = vadd.xlane.f32.xlu0 %v749_v59  ;;  %v709_v57 = vpop.permute.xlu1 %708 }
 0x34a   : > { %v3587_v60 = vsub.f32 %v3450_v62, %v709_v57  ;;  %v3590_v2 = vsub.f32 %v3452_v1, %v709_v57  ;;  %v758_v3 = vadd.f32 %v738_v63, %v737_v61  ;;  %v761_v17 = vadd.f32 %v740_v52, %v739_v50  ;;  %2808 = vset.pattern.permute.xlu0 %v3153_v51 }
 0x34c   : > { %v741_v20 = vmul.f32 %v3587_v60, %v3587_v60  ;;  %v742_v21 = vmul.f32 %v3590_v2, %v3590_v2 }
 0x34d   : > { %759 = vadd.xlane.f32.xlu0 %v758_v3  ;;  %762 = vadd.xlane.f32.xlu1 %v761_v17 }
 0x34e   : > { %v764_v26 = vadd.f32 %v742_v21, %v741_v20 }
 0x351   : > { %765 = vadd.xlane.f32.xlu0 %v764_v26 }
 0x3cc   : > { %v748_v28 = vpop.xlane.xlu1 %747 }
 0x3cd   : > { %v745_v23 = vpop.xlane.xlu0 %744 }
 0x3ce   : > { %v2669_v25 = vpack.c.bf16 %v748_v28, %v745_v23 }
 0x3d0   : > { %2670 = vmatprep.subr.bf16.mxu1 %v2669_v25 }
 0x3d1   : > { %2672 = vmatpush3.bf16.msra.mxu1 %v2669_v25 }
 0x3d2   : > { %v754_v62 = vpop.xlane.xlu0 %753 }
 0x3d6   : > { %v751_v1 = vpop.xlane.xlu0 %750  ;;  %v757_v29 = vpop.xlane.xlu1 %756 }
 0x3d7   : > { %v2673_v27 = vpack.c.bf16 %v754_v62, %v751_v1 }
 0x3d9   : > { %2674 = vmatprep.subr.bf16.mxu1 %v2673_v27 }
 0x3da   : > { %2676 = vmatpush3.bf16.msra.mxu1 %v2673_v27  ;;  %v760_v30 = vpop.xlane.xlu0 %759  ;;  %v763_v43 = vpop.xlane.xlu1 %762 }
 0x3db   : > { %v2677_v42 = vpack.c.bf16 %v760_v30, %v757_v29 }
 0x3dd   : > { %2678 = vmatprep.subr.bf16.mxu1 %v2677_v42 }
 0x3de   : > { %2680 = vmatpush3.bf16.msra.mxu1 %v2677_v42  ;;  %v766_v47 = vpop.xlane.xlu0 %765 }
 0x3df   : > { %v2681_v49 = vpack.c.bf16 %v766_v47, %v763_v43 }
 0x3e1   : > { %2682 = vmatprep.subr.bf16.mxu1 %v2681_v49 }
 0x3e2   : > { %2684 = vmatpush3.bf16.msra.mxu1 %v2681_v49 }
 0x3e5   : > { %2586 = vmatmul.mubr.msk.f32.vlgmr.msra.gmra.mrb[24].mxu1 %vm533_vm1, %v3468_v31 }
 0x3e6   : > { %2588 = vmatprep.mubr.msk.f32.mxu1 %vm533_vm1, %v3473_v32 }
 0x3e9   : > { %2589 = vmatmul.mubr.msk.f32.gmra.mrb[26].mxu1 %vm533_vm1, %v3482_v34 }
 0x3ea   : > { %2591 = vmatprep.mubr.msk.f32.mxu1 %vm533_vm1, %v3487_v36 }
 0x3ed   : > { %2592 = vmatmul.mubr.msk.f32.gmra.mrb[28].mxu1 %vm533_vm1, %v3496_v37 }
 0x3ee   : > { %2594 = vmatprep.mubr.msk.f32.mxu1 %vm533_vm1, %v3501_v38 }
 0x3f1   : > { %2595 = vmatmul.mubr.msk.f32.gmra.mrb[30].mxu1 %vm533_vm1, %v3510_v41 }
 0x3f2   : > { %2613 = vmatprep.mubr.msk.f32.mxu1 %vm533_vm1, %v3461_v5 }
 0x4b8   : > { %v2587_v33 = vpop.f32.mrb[24].mxu1 }
 0x4b9   : > { %v873_v35 = vmul.f32 0.001953125, %v2587_v33  ;;  %v833_v53 = vpop.f32.mrb[25].mxu1 }
 0x4ba   : > { %v872_v45 = vmul.f32 0.001953125, %v833_v53 }
 0x4bb   : > { %v881_v58 = vadd.f32 1e-05, %v873_v35 }
 0x4bc   : > { %v880_v59 = vadd.f32 1e-05, %v872_v45  ;;  %v2590_v61 = vpop.f32.mrb[26].mxu1  ;;  %v3155_v45 = vmov 1  }
 0x4bd   : > { %2844 = vrsqrt.f32 %v881_v58  ;;  %v875_v63 = vmul.f32 0.001953125, %v2590_v61  ;;  %v843_v50 = vpop.f32.mrb[27].mxu1 }
 0x4be   : > { %2846 = vrsqrt.f32 %v880_v59  ;;  %v874_v52 = vmul.f32 0.001953125, %v843_v50 }
 0x4bf   : > { %v883_v57 = vadd.f32 1e-05, %v875_v63 }
 0x4c0   : > { %v2593_v3 = vpop.f32.mrb[28].mxu1  ;;  %v882_v5 = vadd.f32 1e-05, %v874_v52 }
 0x4c1   : > { %2848 = vrsqrt.f32 %v883_v57  ;;  %v877_v17 = vmul.f32 0.001953125, %v2593_v3  ;;  %v853_v20 = vpop.f32.mrb[29].mxu1 }
 0x4c2   : > { %v876_v21 = vmul.f32 0.001953125, %v853_v20  ;;  %2850 = vrsqrt.f32 %v882_v5 }
 0x4c3   : > { %v885_v26 = vadd.f32 1e-05, %v877_v17 }
 0x4c4   : > { %v884_v28 = vadd.f32 1e-05, %v876_v21  ;;  %v2596_v23 = vpop.f32.mrb[30].mxu1 }
 0x4c5   : > { %v879_v25 = vmul.f32 0.001953125, %v2596_v23  ;;  %v863_v62 = vpop.f32.mrb[31].mxu1 }
 0x4c6   : > { %2852 = vrsqrt.f32 %v884_v28  ;;  %v878_v1 = vmul.f32 0.001953125, %v863_v62  ;;  %v3156_v62 = vmov 3  }
 0x4c7   : > { %v2845_v27 = vpop.eup %2844  ;;  %2854 = vrsqrt.f32 %v885_v26  ;;  %v887_v30 = vadd.f32 1e-05, %v879_v25 }
 0x4c8   : > { %v2847_v29 = vpop.eup %2846  ;;  %906 = vrot.lane.b32.xlu0 %v2845_v27, %s3154_s17  ;;  %v886_v42 = vadd.f32 1e-05, %v878_v1 }
 0x4c9   : > { %904 = vrot.lane.b32.xlu1 %v2847_v29, %s3154_s17 }
 0x4ca   : > { %2856 = vrsqrt.f32 %v886_v42 }
 0x4cb   : > { %v2849_v43 = vpop.eup %2848  ;;  %2858 = vrsqrt.f32 %v887_v30 }
 0x4cc   : > { %v2851_v47 = vpop.eup %2850 }
 0x4cd   : > { %910 = vrot.lane.b32.xlu1 %v2849_v43, %s3154_s17 }
 0x4d0   : > { %v2853_v49 = vpop.eup %2852 }
 0x4d1   : > { %908 = vrot.lane.b32.xlu1 %v2851_v47, %s3154_s17  ;;  %912 = vrot.lane.b32.xlu0 %v2853_v49, %s3154_s17  ;;  %v2855_v33 = vpop.eup %2854 }
 0x4d4   : > { %v2857_v35 = vpop.eup %2856 }
 0x4d5   : > { %914 = vrot.lane.b32.xlu1 %v2855_v33, %s3154_s17  ;;  %916 = vrot.lane.b32.xlu0 %v2857_v35, %s3154_s17  ;;  %v2859_v53 = vpop.eup %2858 }
 0x4d9   : > { %918 = vrot.lane.b32.xlu1 %v2859_v53, %s3154_s17  ;;  %997 = vperm.xlu0 %2808, %v3361_v10   ;;  %s3080_s17 = sshll.u32 %s3162_s14, 4  ;;  %s3081_s17 = int_to_ptr.vmem [resolvable:$false] %s3080_s17 }
 0x4da   : > { %s3082_s20 = scalar_lea.vmem %s3081_s17, 512  ;;  %p3083_p4 = scmp.lt.s32.totalorder %s4069_s12, %s3081_s17 }
 0x4db   : > { %p3084_p7 = scmp.lt.s32.totalorder %s3082_s20, %s3076_s29 }
 0x4dd   : > { %993 = vperm.xlu1 %2807, %v3349_v8   ;;  %1001 = vperm.xlu0 %2808, %v3355_v9   ;;  %p3085_p8 = por %p3084_p7, %p3083_p4 }
 0x4df   : > { %p3086_p11 = pnand %p3085_p8, %p3079_p3 }
 0x4e1   : > { %1005 = vperm.xlu1 %2807, %v3367_v11   ;;  %2810 = vset.pattern.permute.xlu0 %v3155_v45 }
 0x4e5   : > { %1009 = vperm.xlu1 %2807, %v3376_v13  }
 0x4e9   : > { %2809 = vset.pattern.permute.xlu1 %v3155_v45 }
 0x53a   : > { %v907_v58 = vpop.permute.xlu0 %906 }
 0x53b   : > { %v929_v59 = vmul.f32 %v907_v58, %v3361_v10  ;;  %v905_v61 = vpop.permute.xlu1 %904 }
 0x53c   : > { %v928_v63 = vmul.f32 %v905_v61, %v3349_v8 }
 0x53d   : > { %943 = vperm.xlu1 %2809, %v929_v59  }
 0x53e   : > { %938 = vperm.xlu0 %2810, %v928_v63  }
 0x53f   : > { %v911_v50 = vpop.permute.xlu1 %910 }
 0x540   : > { %v931_v52 = vmul.f32 %v911_v50, %v3367_v11 }
 0x542   : > { %953 = vperm.xlu1 %2809, %v931_v52   ;;  %2811 = vset.pattern.permute.xlu0 %v3153_v51 }
 0x543   : > { %v909_v57 = vpop.permute.xlu1 %908  ;;  %1013 = vperm.xlu0 %2811, %v3382_v14   ;;  %v913_v3 = vpop.permute.xlu0 %912 }
 0x544   : > { %v930_v5 = vmul.f32 %v909_v57, %v3355_v9  ;;  %v932_v17 = vmul.f32 %v913_v3, %v3376_v13 }
 0x546   : > { %948 = vperm.xlu1 %2809, %v930_v5  }
 0x547   : > { %v915_v20 = vpop.permute.xlu1 %914  ;;  %2812 = vset.pattern.permute.xlu0 %v3155_v45  ;;  %v917_v23 = vpop.permute.xlu0 %916 }
 0x548   : > { %v933_v21 = vmul.f32 %v915_v20, %v3382_v14  ;;  %958 = vperm.xlu0 %2812, %v932_v17   ;;  %v934_v25 = vmul.f32 %v917_v23, %v3388_v15 }
 0x54a   : > { %963 = vperm.xlu1 %2809, %v933_v21  }
 0x54b   : > { %v919_v26 = vpop.permute.xlu1 %918 }
 0x54c   : > { %v935_v28 = vmul.f32 %v919_v26, %v3397_v16  ;;  %2813 = vset.pattern.permute.xlu0 %v3153_v51 }
 0x54d   : > { %1017 = vperm.xlu0 %2813, %v3388_v15  }
 0x54e   : > { %973 = vperm.xlu1 %2809, %v935_v28  }
 0x551   : > { %2815 = vset.pattern.permute.xlu0 %v3156_v62 }
 0x552   : > { %968 = vperm.xlu1 %2809, %v934_v25   ;;  %1169 = vperm.xlu0 %2815, %v3349_v8  }
 0x556   : > { %2814 = vset.pattern.permute.xlu1 %v3153_v51  ;;  %1181 = vperm.xlu0 %2815, %v3367_v11  }
 0x557   : > { %1021 = vperm.xlu1 %2814, %v3397_v16  }
 0x558   : > { %v998_v8 = vpop.permute.xlu0 %997 }
 0x55a   : > { %1189 = vperm.xlu0 %2815, %v3382_v14  }
 0x55b   : > { %2816 = vset.pattern.permute.xlu1 %v3156_v62 }
 0x55c   : > { %1173 = vperm.xlu1 %2816, %v3361_v10   ;;  %v994_v51 = vpop.permute.xlu1 %993  ;;  %v1002_v10 = vpop.permute.xlu0 %1001 }
 0x55e   : > { %1197 = vperm.xlu0 %2815, %v3397_v16  }
 0x560   : > { %1177 = vperm.xlu1 %2816, %v3355_v9   ;;  %v1006_v1 = vpop.permute.xlu1 %1005 }
 0x562   : > { %2817 = vset.pattern.permute.xlu0 %v3152_v0 }
 0x564   : > { %1185 = vperm.xlu1 %2816, %v3376_v13   ;;  %v1010_v27 = vpop.permute.xlu1 %1009 }
 0x568   : > { %1193 = vperm.xlu1 %2816, %v3388_v15  }
 0x56c   : > { %2818 = vset.pattern.permute.xlu1 %v3152_v0 }
 0x5bc   : > { %v944_v11 = vpop.permute.xlu1 %943 }
 0x5bd   : > { %v978_v9 = vmul.f32 %v944_v11, %v3517_v7  ;;  %v979_v14 = vmul.f32 %v944_v11, %v3520_v12  ;;  %v939_v29 = vpop.permute.xlu0 %938 }
 0x5be   : > { %v976_v13 = vmul.f32 %v939_v29, %v3523_v18  ;;  %v977_v16 = vmul.f32 %v939_v29, %v3526_v19 }
 0x5bf   : > { %v3647_v15 = vadd.f32 %v998_v8, %v978_v9  ;;  %v3649_v30 = vadd.f32 %v998_v8, %v979_v14 }
 0x5c0   : > { %v3651_v42 = vadd.f32 %v994_v51, %v976_v13  ;;  %v3653_v43 = vadd.f32 %v994_v51, %v977_v16 }
 0x5c1   : > { %v2399_v47 = vmul.f32 -1.442695, %v3647_v15  ;;  %v2400_v49 = vmul.f32 -1.442695, %v3649_v30  ;;  %v954_v7 = vpop.permute.xlu1 %953 }
 0x5c2   : > { %v2397_v12 = vmul.f32 -1.442695, %v3651_v42  ;;  %v2398_v33 = vmul.f32 -1.442695, %v3653_v43  ;;  %v982_v18 = vmul.f32 %v954_v7, %v3537_v22  ;;  %v983_v19 = vmul.f32 %v954_v7, %v3540_v24  ;;  %v1014_v35 = vpop.permute.xlu0 %1013 }
 0x5c3   : > { %2860 = vpow2.f32 %v2399_v47 }
 0x5c4   : > { %2862 = vpow2.f32 %v2400_v49  ;;  %v3661_v53 = vadd.f32 %v1006_v1, %v982_v18  ;;  %v3663_v45 = vadd.f32 %v1006_v1, %v983_v19 }
 0x5c5   : > { %2864 = vpow2.f32 %v2397_v12  ;;  %v949_v58 = vpop.permute.xlu1 %948 }
 0x5c6   : > { %2866 = vpow2.f32 %v2398_v33  ;;  %v2403_v59 = vmul.f32 -1.442695, %v3661_v53  ;;  %v2404_v61 = vmul.f32 -1.442695, %v3663_v45  ;;  %v980_v63 = vmul.f32 %v949_v58, %v3547_v44 }
 0x5c7   : > { %v981_v22 = vmul.f32 %v949_v58, %v3550_v39  ;;  %v959_v50 = vpop.permute.xlu0 %958 }
 0x5c8   : > { %2868 = vpow2.f32 %v2403_v59  ;;  %v3669_v24 = vadd.f32 %v1002_v10, %v980_v63  ;;  %v984_v52 = vmul.f32 %v959_v50, %v3553_v40  ;;  %v985_v57 = vmul.f32 %v959_v50, %v3556_v46 }
 0x5c9   : > { %2870 = vpow2.f32 %v2404_v61  ;;  %v3673_v3 = vadd.f32 %v1002_v10, %v981_v22  ;;  %v964_v5 = vpop.permute.xlu1 %963 }
 0x5ca   : > { %v2401_v17 = vmul.f32 -1.442695, %v3669_v24  ;;  %v3676_v20 = vadd.f32 %v1010_v27, %v984_v52  ;;  %v3678_v21 = vadd.f32 %v1010_v27, %v985_v57  ;;  %v986_v44 = vmul.f32 %v964_v5, %v3567_v54 }
 0x5cb   : > { %v2402_v39 = vmul.f32 -1.442695, %v3673_v3  ;;  %v987_v26 = vmul.f32 %v964_v5, %v3570_v48 }
 0x5cc   : > { %2872 = vpow2.f32 %v2401_v17  ;;  %v2405_v40 = vmul.f32 -1.442695, %v3676_v20  ;;  %v2406_v46 = vmul.f32 -1.442695, %v3678_v21  ;;  %v3685_v28 = vadd.f32 %v1014_v35, %v986_v44  ;;  %v1018_v14 = vpop.permute.xlu0 %1017 }
 0x5cd   : > { %v2861_v23 = vpop.eup %2860  ;;  %2874 = vpow2.f32 %v2402_v39  ;;  %v974_v25 = vpop.permute.xlu1 %973  ;;  %v3687_v54 = vadd.f32 %v1014_v35, %v987_v26 }
 0x5ce   : > { %v2863_v62 = vpop.eup %2862  ;;  %v1090_v51 = vadd.f32 1.0, %v2861_v23  ;;  %2876 = vpow2.f32 %v2405_v40  ;;  %v2407_v27 = vmul.f32 -1.442695, %v3685_v28  ;;  %v990_v18 = vmul.f32 %v974_v25, %v3587_v60 }
 0x5cf   : > { %v2865_v8 = vpop.eup %2864  ;;  %v1091_v1 = vadd.f32 1.0, %v2863_v62  ;;  %2878 = vpow2.f32 %v2406_v46  ;;  %v2408_v7 = vmul.f32 -1.442695, %v3687_v54  ;;  %v991_v19 = vmul.f32 %v974_v25, %v3590_v2 }
 0x5d0   : > { %v2867_v10 = vpop.eup %2866  ;;  %2880 = vrcp.f32 %v1090_v51  ;;  %v1088_v48 = vadd.f32 1.0, %v2865_v8 }
 0x5d1   : > { %2882 = vrcp.f32 %v1091_v1  ;;  %v1089_v11 = vadd.f32 1.0, %v2867_v10  ;;  %v969_v9 = vpop.permute.xlu1 %968 }
 0x5d2   : > { %v2869_v29 = vpop.eup %2868  ;;  %2884 = vrcp.f32 %v1088_v48  ;;  %v988_v13 = vmul.f32 %v969_v9, %v3573_v55  ;;  %v989_v16 = vmul.f32 %v969_v9, %v3576_v56 }
 0x5d3   : > { %v2871_v47 = vpop.eup %2870  ;;  %2886 = vrcp.f32 %v1089_v11  ;;  %v1094_v49 = vadd.f32 1.0, %v2869_v29 }
 0x5d4   : > { %v1095_v12 = vadd.f32 1.0, %v2871_v47  ;;  %2888 = vpow2.f32 %v2407_v27  ;;  %v3693_v33 = vadd.f32 %v1018_v14, %v988_v13  ;;  %v3697_v35 = vadd.f32 %v1018_v14, %v989_v16 }
 0x5d5   : > { %2890 = vrcp.f32 %v1094_v49 }
 0x5d6   : > { %v2873_v58 = vpop.eup %2872  ;;  %2892 = vrcp.f32 %v1095_v12  ;;  %v2409_v55 = vmul.f32 -1.442695, %v3693_v33  ;;  %v1022_v56 = vpop.permute.xlu1 %1021  ;;  %v2410_v2 = vmul.f32 -1.442695, %v3697_v35 }
 0x5d7   : > { %v2875_v59 = vpop.eup %2874  ;;  %v1092_v61 = vadd.f32 1.0, %v2873_v58  ;;  %2894 = vpow2.f32 %v2408_v7  ;;  %v3700_v63 = vadd.f32 %v1022_v56, %v990_v18  ;;  %v3702_v22 = vadd.f32 %v1022_v56, %v991_v19 }
 0x5d8   : > { %v2877_v50 = vpop.eup %2876  ;;  %v1093_v52 = vadd.f32 1.0, %v2875_v59  ;;  %2896 = vpow2.f32 %v2409_v55 }
 0x5d9   : > { %v2879_v60 = vpop.eup %2878  ;;  %2898 = vrcp.f32 %v1092_v61  ;;  %v2411_v5 = vmul.f32 -1.442695, %v3700_v63  ;;  %v2412_v44 = vmul.f32 -1.442695, %v3702_v22  ;;  %v1096_v40 = vadd.f32 1.0, %v2877_v50 }
 0x5da   : > { %v2881_v57 = vpop.eup %2880  ;;  %2900 = vrcp.f32 %v1093_v52  ;;  %v1097_v51 = vadd.f32 1.0, %v2879_v60 }
 0x5db   : > { %v2883_v17 = vpop.eup %2882  ;;  %v1138_v39 = vmul.f32 %v2881_v57, %v3647_v15  ;;  %2902 = vpow2.f32 %v2410_v2 }
 0x5dc   : > { %v2885_v26 = vpop.eup %2884  ;;  %v1139_v46 = vmul.f32 %v2883_v17, %v3649_v30  ;;  %2904 = vpow2.f32 %v2411_v5 }
 0x5dd   : > { %v2887_v23 = vpop.eup %2886  ;;  %v1136_v25 = vmul.f32 %v2885_v26, %v3651_v42  ;;  %2906 = vpow2.f32 %v2412_v44 }
 0x5de   : > { %v2889_v62 = vpop.eup %2888  ;;  %v1137_v8 = vmul.f32 %v2887_v23, %v3653_v43  ;;  %2908 = vrcp.f32 %v1096_v40 }
 0x5df   : > { %v2891_v1 = vpop.eup %2890  ;;  %v1098_v10 = vadd.f32 1.0, %v2889_v62  ;;  %v1160_v48 = vpack.c.bf16 %v1138_v39, %v1136_v25 }
 0x5e0   : > { %v2893_v27 = vpop.eup %2892  ;;  %v1161_v15 = vpack.c.bf16 %v1139_v46, %v1137_v8  ;;  %v1142_v29 = vmul.f32 %v2891_v1, %v3661_v53  ;;  %v1174_v46 = vpop.permute.xlu1 %1173 }
 0x5e1   : > { %v2895_v11 = vpop.eup %2894  ;;  %2910 = vrcp.f32 %v1098_v10  ;;  %v1143_v13 = vmul.f32 %v2893_v27, %v3663_v45 }
 0x5e2   : > { %v2897_v9 = vpop.eup %2896  ;;  %2912 = vrcp.f32 %v1097_v51  ;;  %v1099_v30 = vadd.f32 1.0, %v2895_v11  ;;  %1232 = vmatprep.subr.bf16.mxu0 %v1161_v15 }
 0x5e3   : > { %v2899_v14 = vpop.eup %2898  ;;  %1233 = vmatpush1.bf16.msra.mxu0 %v1160_v48  ;;  %v1100_v47 = vadd.f32 1.0, %v2897_v9 }
 0x5e4   : > { %v2901_v42 = vpop.eup %2900  ;;  %v1140_v43 = vmul.f32 %v2899_v14, %v3669_v24  ;;  %2914 = vrcp.f32 %v1099_v30  ;;  %v1178_v48 = vpop.permute.xlu1 %1177 }
 0x5e5   : > { %v1141_v16 = vmul.f32 %v2901_v42, %v3673_v3  ;;  %v2903_v7 = vpop.eup %2902  ;;  %2916 = vrcp.f32 %v1100_v47 }
 0x5e6   : > { %v1162_v49 = vpack.c.bf16 %v1142_v29, %v1140_v43  ;;  %v2905_v18 = vpop.eup %2904  ;;  %v1101_v19 = vadd.f32 1.0, %v2903_v7 }
 0x5e7   : > { %v1163_v12 = vpack.c.bf16 %v1143_v13, %v1141_v16  ;;  %v2907_v58 = vpop.eup %2906  ;;  %v1102_v55 = vadd.f32 1.0, %v2905_v18 }
 0x5e8   : > { %v2909_v56 = vpop.eup %2908  ;;  %2918 = vrcp.f32 %v1101_v19  ;;  %v1103_v53 = vadd.f32 1.0, %v2907_v58 }
 0x5e9   : > { %1234 = vmatprep.subr.bf16.mxu0 %v1163_v12  ;;  %2920 = vrcp.f32 %v1102_v55  ;;  %v1144_v61 = vmul.f32 %v2909_v56, %v3676_v20 }
 0x5ea   : > { %1235 = vmatpush1.bf16.msra.mxu0 %v1162_v49  ;;  %2922 = vrcp.f32 %v1103_v53  ;;  %v1186_v49 = vpop.permute.xlu1 %1185 }
 0x5eb   : > { %v2911_v24 = vpop.eup %2910 }
 0x5ec   : > { %v2913_v59 = vpop.eup %2912  ;;  %v1146_v45 = vmul.f32 %v2911_v24, %v3685_v28 }
 0x5ed   : > { %v1145_v50 = vmul.f32 %v2913_v59, %v3678_v21 }
 0x5ee   : > { %v2915_v3 = vpop.eup %2914  ;;  %v1164_v60 = vpack.c.bf16 %v1146_v45, %v1144_v61 }
 0x5ef   : > { %v1147_v52 = vmul.f32 %v2915_v3, %v3687_v54  ;;  %v2917_v57 = vpop.eup %2916  ;;  %v2832_v54 = vld [vmem:[#allocation2] sm:$0xff]   ;;  %v1194_v3 = vpop.permute.xlu1 %1193 }
 0x5f0   : > { %v1148_v39 = vmul.f32 %v2917_v57, %v3693_v33  ;;  %v2833_v33 = vld [vmem:[#allocation2 + $0x8] sm:$0xff]  }
 0x5f1   : > { %v1165_v2 = vpack.c.bf16 %v1147_v52, %v1145_v50 }
 0x5f2   : > { %v2919_v5 = vpop.eup %2918 }
 0x5f3   : > { %1236 = vmatprep.subr.bf16.mxu0 %v1165_v2  ;;  %v2921_v17 = vpop.eup %2920  ;;  %v1149_v26 = vmul.f32 %v2919_v5, %v3697_v35  ;;  %v2834_v35 = vld [vmem:[#allocation2 + $0x10] sm:$0xff]  }
 0x5f4   : > { %1237 = vmatpush1.bf16.msra.mxu0 %v1164_v60  ;;  %v2923_v44 = vpop.eup %2922  ;;  %v1150_v28 = vmul.f32 %v2921_v17, %v3700_v63  ;;  %v2835_v63 = vld [vmem:[#allocation2 + $0x18] sm:$0xff]  }
 0x5f5   : > { %v1151_v20 = vmul.f32 %v2923_v44, %v3702_v22 }
 0x5f6   : > { %v1166_v40 = vpack.c.bf16 %v1150_v28, %v1148_v39 }
 0x5f7   : > { %v1167_v21 = vpack.c.bf16 %v1151_v20, %v1149_v26 }
 0x5f9   : > { %1238 = vmatprep.subr.bf16.mxu0 %v1167_v21 }
 0x5fa   : > { %1239 = vmatpush1.bf16.msra.mxu0 %v1166_v40 }
 0x5fb   : > { %1979 = vmatprep.subr.bf16.mxu0 %v3337_v4  ;;  %v1170_v4 = vpop.permute.xlu0 %1169 }
 0x5fd   : > { %2417 = vmatmul.mubr.msk.bf16.vlgmr.msra.gmra.mrb[0].mxu0 %vm533_vm1, %v2832_v54 }
 0x5fe   : > { %1274 = vmatprep.mubr.bf16.mxu0 %v3152_v0  ;;  %1980 = vmatpush1.bf16.msra.mxu0 %v3339_v6 }
 0x5ff   : > { %v1182_v30 = vpop.permute.xlu0 %1181 }
 0x603   : > { %v1190_v19 = vpop.permute.xlu0 %1189 }
 0x605   : > { %2418 = vmatmul.mubr.msk.bf16.gmra.mrb[4].mxu0 %vm533_vm1, %v2833_v33 }
 0x606   : > { %1284 = vmatprep.mubr.bf16.mxu0 %v3152_v0 }
 0x607   : > { %v1198_v60 = vpop.permute.xlu0 %1197 }
 0x60d   : > { %2419 = vmatmul.mubr.msk.bf16.gmra.mrb[8].mxu0 %vm533_vm1, %v2834_v35 }
 0x60e   : > { %1294 = vmatprep.mubr.bf16.mxu0 %v3152_v0 }
 0x615   : > { %2420 = vmatmul.mubr.msk.bf16.gmra.mrb[12].mxu0 %vm533_vm1, %v2835_v63 }
 0x616   : > { %2011 = vmatprep.mubr.bf16.mxu0 %v3152_v0 }
 0x6d0   : > { %v1266_v22 = vpop.f32.mrb[0].mxu0 }
 0x6d1   : > { %v3733_v23 = vadd.f32 %v1266_v22, %v1170_v4  ;;  %v1268_v6 = vpop.f32.mrb[1].mxu0 }
 0x6d2   : > { %v3735_v25 = vadd.f32 %v1268_v6, %v1170_v4  ;;  %v1270_v62 = vpop.f32.mrb[2].mxu0 }
 0x6d3   : > { %v3737_v51 = vadd.f32 %v1270_v62, %v1174_v46  ;;  %v1272_v8 = vpop.f32.mrb[3].mxu0 }
 0x6d4   : > { %v3739_v1 = vadd.f32 %v1272_v8, %v1174_v46  ;;  %v1305_v10 = vadd.f32 %v3735_v25, %v3733_v23 }
 0x6d6   : > { %1306 = vadd.xlane.f32.xlu1 %v1305_v10  ;;  %v1308_v27 = vadd.f32 %v3739_v1, %v3737_v51 }
 0x6d8   : > { %v1276_v15 = vpop.f32.mrb[4].mxu0  ;;  %1309 = vadd.xlane.f32.xlu0 %v1308_v27 }
 0x6d9   : > { %v3745_v11 = vadd.f32 %v1276_v15, %v1178_v48  ;;  %v1278_v9 = vpop.f32.mrb[5].mxu0 }
 0x6da   : > { %v3747_v14 = vadd.f32 %v1278_v9, %v1178_v48  ;;  %v1280_v42 = vpop.f32.mrb[6].mxu0 }
 0x6db   : > { %v3749_v29 = vadd.f32 %v1280_v42, %v1182_v30  ;;  %v1282_v43 = vpop.f32.mrb[7].mxu0 }
 0x6dc   : > { %v3751_v13 = vadd.f32 %v1282_v43, %v1182_v30  ;;  %v1311_v16 = vadd.f32 %v3747_v14, %v3745_v11 }
 0x6de   : > { %1312 = vadd.xlane.f32.xlu0 %v1311_v16  ;;  %v1314_v47 = vadd.f32 %v3751_v13, %v3749_v29 }
 0x6e0   : > { %v1286_v7 = vpop.f32.mrb[8].mxu0  ;;  %1315 = vadd.xlane.f32.xlu1 %v1314_v47 }
 0x6e1   : > { %v3757_v12 = vadd.f32 %v1286_v7, %v1186_v49  ;;  %v1288_v18 = vpop.f32.mrb[9].mxu0 }
 0x6e2   : > { %v3759_v58 = vadd.f32 %v1288_v18, %v1186_v49  ;;  %v1290_v55 = vpop.f32.mrb[10].mxu0 }
 0x6e3   : > { %v3761_v56 = vadd.f32 %v1290_v55, %v1190_v19  ;;  %v1292_v53 = vpop.f32.mrb[11].mxu0 }
 0x6e4   : > { %v3763_v24 = vadd.f32 %v1292_v53, %v1190_v19  ;;  %v1317_v59 = vadd.f32 %v3759_v58, %v3757_v12 }
 0x6e6   : > { %1318 = vadd.xlane.f32.xlu0 %v1317_v59  ;;  %v1320_v45 = vadd.f32 %v3763_v24, %v3761_v56 }
 0x6e8   : > { %v1296_v61 = vpop.f32.mrb[12].mxu0  ;;  %1321 = vadd.xlane.f32.xlu1 %v1320_v45 }
 0x6e9   : > { %v3769_v50 = vadd.f32 %v1296_v61, %v1194_v3  ;;  %v1298_v52 = vpop.f32.mrb[13].mxu0 }
 0x6ea   : > { %v3771_v2 = vadd.f32 %v1298_v52, %v1194_v3  ;;  %v1300_v57 = vpop.f32.mrb[14].mxu0 }
 0x6eb   : > { %v3773_v5 = vadd.f32 %v1300_v57, %v1198_v60  ;;  %v1302_v17 = vpop.f32.mrb[15].mxu0 }
 0x6ec   : > { %v3775_v44 = vadd.f32 %v1302_v17, %v1198_v60  ;;  %v1323_v39 = vadd.f32 %v3771_v2, %v3769_v50 }
 0x6ee   : > { %1324 = vadd.xlane.f32.xlu0 %v1323_v39  ;;  %v1326_v28 = vadd.f32 %v3775_v44, %v3773_v5 }
 0x6f0   : > { %1327 = vadd.xlane.f32.xlu1 %v1326_v28 }
 0x763   : > { %v1307_v26 = vpop.xlane.xlu1 %1306 }
 0x765   : > { %v1310_v20 = vpop.xlane.xlu0 %1309 }
 0x766   : > { %v2685_v40 = vpack.c.bf16 %v1310_v20, %v1307_v26 }
 0x768   : > { %2686 = vmatprep.subr.bf16.mxu1 %v2685_v40 }
 0x769   : > { %2688 = vmatpush3.bf16.msra.mxu1 %v2685_v40 }
 0x76b   : > { %v1313_v21 = vpop.xlane.xlu0 %1312 }
 0x76d   : > { %v1316_v54 = vpop.xlane.xlu1 %1315 }
 0x76e   : > { %v2689_v33 = vpack.c.bf16 %v1316_v54, %v1313_v21 }
 0x770   : > { %2690 = vmatprep.subr.bf16.mxu1 %v2689_v33 }
 0x771   : > { %2692 = vmatpush3.bf16.msra.mxu1 %v2689_v33 }
 0x773   : > { %v1319_v35 = vpop.xlane.xlu0 %1318 }
 0x775   : > { %v1322_v63 = vpop.xlane.xlu1 %1321 }
 0x776   : > { %v2693_v4 = vpack.c.bf16 %v1322_v63, %v1319_v35 }
 0x778   : > { %2694 = vmatprep.subr.bf16.mxu1 %v2693_v4 }
 0x779   : > { %2696 = vmatpush3.bf16.msra.mxu1 %v2693_v4 }
 0x77b   : > { %v1325_v22 = vpop.xlane.xlu0 %1324 }
 0x77d   : > { %v1328_v46 = vpop.xlane.xlu1 %1327 }
 0x77e   : > { %v2697_v6 = vpack.c.bf16 %v1328_v46, %v1325_v22 }
 0x780   : > { %2698 = vmatprep.subr.bf16.mxu1 %v2697_v6 }
 0x781   : > { %2700 = vmatpush3.bf16.msra.mxu1 %v2697_v6 }
 0x784   : > { %2614 = vmatmul.mubr.msk.f32.vlgmr.msra.gmra.mrb[32].mxu1 %vm533_vm1, %v3468_v31  ;;  %v3004_v31 = vld [vmem:[%s4115_s6] sm:$0xff] }
 0x785   : > { %2616 = vmatprep.mubr.msk.f32.mxu1 %vm533_vm1, %v3473_v32 }
 0x788   : > { %2617 = vmatmul.mubr.msk.f32.gmra.mrb[34].mxu1 %vm533_vm1, %v3482_v34 }
 0x789   : > { %2619 = vmatprep.mubr.msk.f32.mxu1 %vm533_vm1, %v3487_v36 }
 0x78c   : > { %2620 = vmatmul.mubr.msk.f32.gmra.mrb[36].mxu1 %vm533_vm1, %v3496_v37 }
 0x78d   : > { %2622 = vmatprep.mubr.msk.f32.mxu1 %vm533_vm1, %v3501_v38 }
 0x790   : > { %2623 = vmatmul.mubr.msk.f32.gmra.mrb[38].mxu1 %vm533_vm1, %v3510_v41 }
 0x791   : > { %2641 = vmatprep.mubr.msk.f32.mxu1 %vm533_vm1, %v3004_v31 }
 0x857   : > { %v2615_v32 = vpop.f32.mrb[32].mxu1 }
 0x858   : > { %v1435_v34 = vmul.f32 0.001953125, %v2615_v32  ;;  %v1395_v62 = vpop.f32.mrb[33].mxu1 }
 0x859   : > { %v1434_v8 = vmul.f32 0.001953125, %v1395_v62 }
 0x85a   : > { %1449 = vperm.xlu1 %2818, %v1435_v34  }
 0x85b   : > { %1444 = vperm.xlu0 %2817, %v1434_v8   ;;  %v2618_v36 = vpop.f32.mrb[34].mxu1 }
 0x85c   : > { %v1437_v37 = vmul.f32 0.001953125, %v2618_v36  ;;  %v1405_v10 = vpop.f32.mrb[35].mxu1 }
 0x85d   : > { %v1436_v48 = vmul.f32 0.001953125, %v1405_v10 }
 0x85e   : > { %1459 = vperm.xlu1 %2818, %v1437_v37  }
 0x85f   : > { %v2621_v38 = vpop.f32.mrb[36].mxu1 }
 0x860   : > { %v1415_v27 = vpop.f32.mrb[37].mxu1  ;;  %v1439_v41 = vmul.f32 0.001953125, %v2621_v38 }
 0x861   : > { %v1438_v30 = vmul.f32 0.001953125, %v1415_v27 }
 0x862   : > { %1454 = vperm.xlu1 %2818, %v1436_v48  }
 0x863   : > { %v2624_v15 = vpop.f32.mrb[38].mxu1 }
 0x864   : > { %v1425_v9 = vpop.f32.mrb[39].mxu1  ;;  %v1441_v43 = vmul.f32 0.001953125, %v2624_v15 }
 0x865   : > { %v1440_v42 = vmul.f32 0.001953125, %v1425_v9 }
 0x866   : > { %1469 = vperm.xlu1 %2818, %v1439_v41  }
 0x86a   : > { %1464 = vperm.xlu1 %2818, %v1438_v30   ;;  %v3005_v30 = vld [vmem:[%s4115_s6 + $0x8] sm:$0xff] }
 0x86e   : > { %1474 = vperm.xlu1 %2818, %v1440_v42   ;;  %v3006_v42 = vld [vmem:[%s4115_s6 + $0x10] sm:$0xff] }
 0x872   : > { %1479 = vperm.xlu1 %2818, %v1441_v43   ;;  %v3007_v43 = vld [vmem:[%s4115_s6 + $0x18] sm:$0xff] }
 0x8d9   : > { %v1450_v16 = vpop.permute.xlu1 %1449 }
 0x8da   : > { %v3800_v47 = vsub.f32 %v3737_v51, %v1450_v16  ;;  %v3803_v49 = vsub.f32 %v3739_v1, %v1450_v16  ;;  %v1445_v7 = vpop.permute.xlu0 %1444  ;;  %v3008_v16 = vld [vmem:[%s4115_s6 + $0x20] sm:$0xff] }
 0x8db   : > { %v3806_v18 = vsub.f32 %v3733_v23, %v1445_v7  ;;  %v3809_v19 = vsub.f32 %v3735_v25, %v1445_v7  ;;  %v3009_v7 = vld [vmem:[%s4115_s6 + $0x28] sm:$0xff] }
 0x8dc   : > { %v1500_v55 = vmul.f32 %v3800_v47, %v3800_v47  ;;  %v1501_v53 = vmul.f32 %v3803_v49, %v3803_v49 }
 0x8dd   : > { %v1460_v59 = vpop.permute.xlu1 %1459  ;;  %v1498_v51 = vmul.f32 %v3806_v18, %v3806_v18  ;;  %v1499_v1 = vmul.f32 %v3809_v19, %v3809_v19 }
 0x8de   : > { %v3820_v45 = vsub.f32 %v3749_v29, %v1460_v59  ;;  %v3823_v23 = vsub.f32 %v3751_v13, %v1460_v59  ;;  %v1517_v25 = vadd.f32 %v1501_v53, %v1500_v55  ;;  %v3010_v55 = vld [vmem:[%s4115_s6 + $0x30] sm:$0xff]  ;;  %v3011_v53 = vld [vmem:[%s4115_s6 + $0x38] sm:$0xff]  ;;  %v3157_v59 = vmov 5  }
 0x8df   : > { %v1514_v3 = vadd.f32 %v1499_v1, %v1498_v51  ;;  %2819 = vset.pattern.permute.xlu1 %v3157_v59  ;;  %2820 = vset.pattern.permute.xlu0 %v3157_v59 }
 0x8e0   : > { %1518 = vadd.xlane.f32.xlu0 %v1517_v25  ;;  %v1504_v61 = vmul.f32 %v3820_v45, %v3820_v45  ;;  %v1505_v52 = vmul.f32 %v3823_v23, %v3823_v23 }
 0x8e1   : > { %v1455_v60 = vpop.permute.xlu1 %1454  ;;  %1515 = vadd.xlane.f32.xlu1 %v1514_v3 }
 0x8e2   : > { %v3830_v57 = vsub.f32 %v3745_v11, %v1455_v60  ;;  %v3833_v29 = vsub.f32 %v3747_v14, %v1455_v60  ;;  %v1523_v17 = vadd.f32 %v1505_v52, %v1504_v61 }
 0x8e4   : > { %v1502_v13 = vmul.f32 %v3830_v57, %v3830_v57  ;;  %v1503_v39 = vmul.f32 %v3833_v29, %v3833_v29 }
 0x8e5   : > { %v1470_v28 = vpop.permute.xlu1 %1469  ;;  %1524 = vadd.xlane.f32.xlu1 %v1523_v17 }
 0x8e6   : > { %v3840_v26 = vsub.f32 %v3761_v56, %v1470_v28  ;;  %v3843_v20 = vsub.f32 %v3763_v24, %v1470_v28  ;;  %v1520_v11 = vadd.f32 %v1503_v39, %v1502_v13 }
 0x8e8   : > { %1521 = vadd.xlane.f32.xlu0 %v1520_v11  ;;  %v1508_v14 = vmul.f32 %v3840_v26, %v3840_v26  ;;  %v1509_v40 = vmul.f32 %v3843_v20, %v3843_v20 }
 0x8e9   : > { %v1465_v21 = vpop.permute.xlu1 %1464 }
 0x8ea   : > { %v3850_v54 = vsub.f32 %v3757_v12, %v1465_v21  ;;  %v3853_v33 = vsub.f32 %v3759_v58, %v1465_v21  ;;  %v1529_v56 = vadd.f32 %v1509_v40, %v1508_v14 }
 0x8ec   : > { %1530 = vadd.xlane.f32.xlu1 %v1529_v56  ;;  %v1506_v24 = vmul.f32 %v3850_v54, %v3850_v54  ;;  %v1507_v35 = vmul.f32 %v3853_v33, %v3853_v33 }
 0x8ed   : > { %v1475_v63 = vpop.permute.xlu1 %1474 }
 0x8ee   : > { %v3860_v4 = vsub.f32 %v3769_v50, %v1475_v63  ;;  %v3863_v22 = vsub.f32 %v3771_v2, %v1475_v63  ;;  %v1526_v12 = vadd.f32 %v1507_v35, %v1506_v24 }
 0x8f0   : > { %1527 = vadd.xlane.f32.xlu0 %v1526_v12  ;;  %v1510_v58 = vmul.f32 %v3860_v4, %v3860_v4  ;;  %v1511_v46 = vmul.f32 %v3863_v22, %v3863_v22 }
 0x8f1   : > { %v1480_v6 = vpop.permute.xlu1 %1479 }
 0x8f2   : > { %v3870_v31 = vsub.f32 %v3773_v5, %v1480_v6  ;;  %v3873_v32 = vsub.f32 %v3775_v44, %v1480_v6  ;;  %v1532_v50 = vadd.f32 %v1511_v46, %v1510_v58 }
 0x8f4   : > { %1533 = vadd.xlane.f32.xlu0 %v1532_v50  ;;  %v1512_v2 = vmul.f32 %v3870_v31, %v3870_v31  ;;  %v1513_v34 = vmul.f32 %v3873_v32, %v3873_v32 }
 0x8f6   : > { %v1535_v62 = vadd.f32 %v1513_v34, %v1512_v2 }
 0x8f8   : > { %1536 = vadd.xlane.f32.xlu1 %v1535_v62 }
 0x96d   : > { %v1519_v8 = vpop.xlane.xlu0 %1518 }
 0x96e   : > { %v1516_v36 = vpop.xlane.xlu1 %1515 }
 0x96f   : > { %v2701_v37 = vpack.c.bf16 %v1519_v8, %v1516_v36 }
 0x971   : > { %2702 = vmatprep.subr.bf16.mxu1 %v2701_v37 }
 0x972   : > { %2704 = vmatpush3.bf16.msra.mxu1 %v2701_v37  ;;  %v1525_v5 = vpop.xlane.xlu1 %1524 }
 0x975   : > { %v1522_v10 = vpop.xlane.xlu0 %1521 }
 0x976   : > { %v2705_v38 = vpack.c.bf16 %v1525_v5, %v1522_v10 }
 0x978   : > { %2706 = vmatprep.subr.bf16.mxu1 %v2705_v38 }
 0x979   : > { %2708 = vmatpush3.bf16.msra.mxu1 %v2705_v38  ;;  %v1531_v44 = vpop.xlane.xlu1 %1530  ;;  %v3913_v38 = vld [vmem:[%s4116_s7] sm:$0xff] }
 0x97d   : > { %v1528_v48 = vpop.xlane.xlu0 %1527 }
 0x97e   : > { %v2709_v27 = vpack.c.bf16 %v1531_v44, %v1528_v48  ;;  %v3013_v44 = vld [vmem:[%s4116_s7 + $0x10] sm:$0xff]  ;;  %v3014_v48 = vld [vmem:[%s4116_s7 + $0x8] sm:$0xff] }
 0x980   : > { %2710 = vmatprep.subr.bf16.mxu1 %v2709_v27 }
 0x981   : > { %2712 = vmatpush3.bf16.msra.mxu1 %v2709_v27  ;;  %v1534_v41 = vpop.xlane.xlu0 %1533  ;;  %v3159_v27 = vmov 4  }
 0x985   : > { %v1537_v15 = vpop.xlane.xlu1 %1536 }
 0x986   : > { %v2713_v9 = vpack.c.bf16 %v1537_v15, %v1534_v41  ;;  %v3015_v41 = vld [vmem:[%s4116_s7 + $0x18] sm:$0xff]  ;;  %v3016_v15 = vld [vmem:[%s4116_s7 + $0x20] sm:$0xff] }
 0x988   : > { %2714 = vmatprep.subr.bf16.mxu1 %v2713_v9 }
 0x989   : > { %2716 = vmatpush3.bf16.msra.mxu1 %v2713_v9  ;;  %v3017_v9 = vld [vmem:[%s4116_s7 + $0x28] sm:$0xff] }
 0x98c   : > { %2642 = vmatmul.mubr.msk.f32.vlgmr.msra.gmra.mrb[40].mxu1 %vm533_vm1, %v3005_v30 }
 0x98d   : > { %2644 = vmatprep.mubr.msk.f32.mxu1 %vm533_vm1, %v3006_v42 }
 0x990   : > { %2645 = vmatmul.mubr.msk.f32.gmra.mrb[42].mxu1 %vm533_vm1, %v3007_v43 }
 0x991   : > { %2647 = vmatprep.mubr.msk.f32.mxu1 %vm533_vm1, %v3008_v16 }
 0x994   : > { %2648 = vmatmul.mubr.msk.f32.gmra.mrb[44].mxu1 %vm533_vm1, %v3009_v7 }
 0x995   : > { %2650 = vmatprep.mubr.msk.f32.mxu1 %vm533_vm1, %v3010_v55 }
 0x998   : > { %2651 = vmatmul.mubr.msk.f32.gmra.mrb[46].mxu1 %vm533_vm1, %v3011_v53 }
 0x999   : > { %2253 = vmatprep.mubr.bf16.mxu1 %v3152_v0 }
 0xa5f   : > { %v2643_v51 = vpop.f32.mrb[40].mxu1 }
 0xa60   : > { %v1644_v1 = vmul.f32 0.001953125, %v2643_v51  ;;  %v1604_v25 = vpop.f32.mrb[41].mxu1 }
 0xa61   : > { %v1643_v3 = vmul.f32 0.001953125, %v1604_v25 }
 0xa62   : > { %v1652_v61 = vadd.f32 1e-05, %v1644_v1 }
 0xa63   : > { %v1651_v52 = vadd.f32 1e-05, %v1643_v3  ;;  %v2646_v60 = vpop.f32.mrb[42].mxu1 }
 0xa64   : > { %2924 = vrsqrt.f32 %v1652_v61  ;;  %v1646_v17 = vmul.f32 0.001953125, %v2646_v60  ;;  %v1614_v13 = vpop.f32.mrb[43].mxu1 }
 0xa65   : > { %2926 = vrsqrt.f32 %v1651_v52  ;;  %v1645_v39 = vmul.f32 0.001953125, %v1614_v13 }
 0xa66   : > { %v1654_v28 = vadd.f32 1e-05, %v1646_v17  ;;  %v3018_v17 = vld [vmem:[%s4116_s7 + $0x38] sm:$0xff] }
 0xa67   : > { %v1653_v11 = vadd.f32 1e-05, %v1645_v39  ;;  %v2649_v14 = vpop.f32.mrb[44].mxu1  ;;  %v3019_v39 = vld [vmem:[%s4116_s7 + $0x30] sm:$0xff] }
 0xa68   : > { %2928 = vrsqrt.f32 %v1654_v28  ;;  %v1648_v40 = vmul.f32 0.001953125, %v2649_v14  ;;  %v1624_v21 = vpop.f32.mrb[45].mxu1  ;;  %v2837_v14 = vld [vmem:[%s4113_s4 + $0x8] sm:$0xff]  }
 0xa69   : > { %2930 = vrsqrt.f32 %v1653_v11  ;;  %v1647_v56 = vmul.f32 0.001953125, %v1624_v21  ;;  %v2836_v11 = vld [vmem:[%s4113_s4] sm:$0xff]   ;;  %v3160_v21 = vmov 6  }
 0xa6a   : > { %v1656_v24 = vadd.f32 1e-05, %v1648_v40  ;;  %2457 = vmatmul.mubr.msk.bf16.vlgmr.msra.gmra.mrb[16].mxu0 %vm423_vm0, %v2836_v11  ;;  %v2839_v40 = vld [vmem:[%s4113_s4 + $0x18] sm:$0xff]  }
 0xa6b   : > { %v1655_v35 = vadd.f32 1e-05, %v1647_v56  ;;  %v2652_v63 = vpop.f32.mrb[46].mxu1  ;;  %2021 = vmatprep.mubr.bf16.mxu0 %v3152_v0 }
 0xa6c   : > { %2932 = vrsqrt.f32 %v1656_v24  ;;  %v1650_v12 = vmul.f32 0.001953125, %v2652_v63  ;;  %v1634_v58 = vpop.f32.mrb[47].mxu1 }
 0xa6d   : > { %2934 = vrsqrt.f32 %v1655_v35  ;;  %v1649_v46 = vmul.f32 0.001953125, %v1634_v58 }
 0xa6e   : > { %v2925_v6 = vpop.eup %2924  ;;  %v1658_v50 = vadd.f32 1e-05, %v1650_v12 }
 0xa6f   : > { %v2927_v2 = vpop.eup %2926  ;;  %v1657_v34 = vadd.f32 1e-05, %v1649_v46  ;;  %1677 = vrot.lane.b32.xlu1 %v2925_v6, %s3158_s22 }
 0xa70   : > { %2936 = vrsqrt.f32 %v1658_v50  ;;  %1675 = vrot.lane.b32.xlu0 %v2927_v2, %s3158_s22 }
 0xa71   : > { %2938 = vrsqrt.f32 %v1657_v34 }
 0xa72   : > { %v2929_v62 = vpop.eup %2928  ;;  %2458 = vmatmul.mubr.msk.bf16.gmra.mrb[20].mxu0 %vm423_vm0, %v2837_v14 }
 0xa73   : > { %v2931_v8 = vpop.eup %2930  ;;  %2031 = vmatprep.mubr.bf16.mxu0 %v3152_v0 }
 0xa74   : > { %1681 = vrot.lane.b32.xlu0 %v2929_v62, %s3158_s22  ;;  %1679 = vrot.lane.b32.xlu1 %v2931_v8, %s3158_s22 }
 0xa76   : > { %v2933_v36 = vpop.eup %2932 }
 0xa77   : > { %v2935_v37 = vpop.eup %2934 }
 0xa78   : > { %1685 = vrot.lane.b32.xlu0 %v2933_v36, %s3158_s22  ;;  %1683 = vrot.lane.b32.xlu1 %v2935_v37, %s3158_s22 }
 0xa7a   : > { %v2937_v5 = vpop.eup %2936 }
 0xa7b   : > { %v2939_v10 = vpop.eup %2938 }
 0xa7c   : > { %1689 = vrot.lane.b32.xlu0 %v2937_v5, %s3158_s22  ;;  %1687 = vrot.lane.b32.xlu1 %v2939_v10, %s3158_s22 }
 0xa80   : > { %1764 = vperm.xlu1 %2819, %v3913_v38   ;;  %1772 = vperm.xlu0 %2820, %v3013_v44  }
 0xa84   : > { %1768 = vperm.xlu1 %2819, %v3014_v48   ;;  %2821 = vset.pattern.permute.xlu0 %v3159_v27 }
 0xa88   : > { %1776 = vperm.xlu1 %2819, %v3015_v41  }
 0xa8c   : > { %1780 = vperm.xlu1 %2819, %v3016_v15  }
 0xa90   : > { %1784 = vperm.xlu1 %2819, %v3017_v9  }
 0xa94   : > { %2822 = vset.pattern.permute.xlu1 %v3159_v27 }
 0xae1   : > { %v1678_v30 = vpop.permute.xlu1 %1677 }
 0xae2   : > { %v1700_v42 = vmul.f32 %v3014_v48, %v1678_v30  ;;  %v1676_v43 = vpop.permute.xlu0 %1675 }
 0xae3   : > { %v1699_v16 = vmul.f32 %v3913_v38, %v1676_v43 }
 0xae4   : > { %1714 = vperm.xlu0 %2821, %v1700_v42  }
 0xae5   : > { %1709 = vperm.xlu1 %2822, %v1699_v16  }
 0xae6   : > { %v1682_v7 = vpop.permute.xlu0 %1681  ;;  %v1680_v55 = vpop.permute.xlu1 %1679 }
 0xae7   : > { %v1702_v53 = vmul.f32 %v3015_v41, %v1682_v7  ;;  %v1701_v51 = vmul.f32 %v3013_v44, %v1680_v55 }
 0xae9   : > { %1719 = vperm.xlu0 %2821, %v1701_v51   ;;  %1724 = vperm.xlu1 %2822, %v1702_v53  }
 0xaea   : > { %v1686_v1 = vpop.permute.xlu0 %1685  ;;  %v1684_v25 = vpop.permute.xlu1 %1683 }
 0xaeb   : > { %v1704_v3 = vmul.f32 %v3017_v9, %v1686_v1  ;;  %v1703_v61 = vmul.f32 %v3016_v15, %v1684_v25 }
 0xaed   : > { %1734 = vperm.xlu0 %2821, %v1704_v3   ;;  %1729 = vperm.xlu1 %2822, %v1703_v61  }
 0xaee   : > { %v1690_v52 = vpop.permute.xlu0 %1689  ;;  %v1688_v60 = vpop.permute.xlu1 %1687 }
 0xaef   : > { %v1706_v13 = vmul.f32 %v3018_v17, %v1690_v52  ;;  %v1705_v28 = vmul.f32 %v3019_v39, %v1688_v60 }
 0xaf1   : > { %1744 = vperm.xlu1 %2822, %v1706_v13   ;;  %1739 = vperm.xlu0 %2821, %v1705_v28  }
 0xaf5   : > { %2824 = vset.pattern.permute.xlu1 %v3157_v59  ;;  %2823 = vset.pattern.permute.xlu0 %v3157_v59  ;;  %v2838_v59 = vld [vmem:[%s4113_s4 + $0x10] sm:$0xff]  }
 0xaf6   : > { %1792 = vperm.xlu1 %2824, %v3018_v17   ;;  %1788 = vperm.xlu0 %2823, %v3019_v39  }
 0xaf7   : > { %2459 = vmatmul.mubr.msk.bf16.gmra.mrb[24].mxu0 %vm423_vm0, %v2838_v59 }
 0xaf8   : > { %2041 = vmatprep.mubr.bf16.mxu0 %v3152_v0 }
 0xafa   : > { %2825 = vset.pattern.permute.xlu1 %v3160_v21  ;;  %2826 = vset.pattern.permute.xlu0 %v3160_v21 }
 0xafb   : > { %2158 = vperm.xlu1 %2825, %v3913_v38   ;;  %2162 = vperm.xlu0 %2826, %v3014_v48  }
 0xaff   : > { %2460 = vmatmul.mubr.msk.bf16.gmra.mrb[28].mxu0 %vm423_vm0, %v2839_v40  ;;  %2166 = vperm.xlu1 %2825, %v3013_v44   ;;  %v1765_v56 = vpop.permute.xlu1 %1764  ;;  %v1773_v12 = vpop.permute.xlu0 %1772 }
 0xb00   : > { %2116 = vmatprep.mubr.bf16.mxu0 %v3152_v0  ;;  %2174 = vperm.xlu0 %2826, %v3016_v15  }
 0xb03   : > { %2170 = vperm.xlu1 %2825, %v3015_v41   ;;  %v1769_v24 = vpop.permute.xlu1 %1768 }
 0xb04   : > { %2182 = vperm.xlu0 %2826, %v3019_v39  }
 0xb07   : > { %2178 = vperm.xlu1 %2825, %v3017_v9   ;;  %v1777_v35 = vpop.permute.xlu1 %1776 }
 0xb0b   : > { %2186 = vperm.xlu1 %2825, %v3018_v17   ;;  %v1781_v63 = vpop.permute.xlu1 %1780 }
 0xb0f   : > { %v1785_v58 = vpop.permute.xlu1 %1784 }
 0xb63   : > { %v1715_v46 = vpop.permute.xlu0 %1714 }
 0xb64   : > { %v1749_v6 = vmul.f32 %v1715_v46, %v3800_v47  ;;  %v1750_v50 = vmul.f32 %v1715_v46, %v3803_v49  ;;  %v1710_v2 = vpop.permute.xlu1 %1709 }
 0xb65   : > { %v1747_v34 = vmul.f32 %v1710_v2, %v3806_v18  ;;  %v1748_v62 = vmul.f32 %v1710_v2, %v3809_v19 }
 0xb66   : > { %v3965_v8 = vadd.f32 %v1769_v24, %v1749_v6  ;;  %v3967_v36 = vadd.f32 %v1769_v24, %v1750_v50 }
 0xb67   : > { %v3969_v37 = vadd.f32 %v1765_v56, %v1747_v34  ;;  %v3971_v5 = vadd.f32 %v1765_v56, %v1748_v62 }
 0xb68   : > { %v2439_v10 = vmul.f32 -1.442695, %v3965_v8  ;;  %v2440_v44 = vmul.f32 -1.442695, %v3967_v36  ;;  %v1720_v47 = vpop.permute.xlu0 %1719  ;;  %v1725_v48 = vpop.permute.xlu1 %1724 }
 0xb69   : > { %v2437_v49 = vmul.f32 -1.442695, %v3969_v37  ;;  %v2438_v18 = vmul.f32 -1.442695, %v3971_v5  ;;  %v1751_v19 = vmul.f32 %v1720_v47, %v3830_v57  ;;  %v1752_v27 = vmul.f32 %v1720_v47, %v3833_v29 }
 0xb6a   : > { %2940 = vpow2.f32 %v2439_v10  ;;  %v1753_v41 = vmul.f32 %v1725_v48, %v3820_v45  ;;  %v1754_v15 = vmul.f32 %v1725_v48, %v3823_v23 }
 0xb6b   : > { %2942 = vpow2.f32 %v2440_v44  ;;  %v3981_v9 = vadd.f32 %v1773_v12, %v1751_v19  ;;  %v3983_v30 = vadd.f32 %v1773_v12, %v1752_v27 }
 0xb6c   : > { %2944 = vpow2.f32 %v2437_v49  ;;  %v3985_v42 = vadd.f32 %v1777_v35, %v1753_v41  ;;  %v3987_v43 = vadd.f32 %v1777_v35, %v1754_v15  ;;  %v1735_v16 = vpop.permute.xlu0 %1734  ;;  %v1730_v7 = vpop.permute.xlu1 %1729 }
 0xb6d   : > { %2946 = vpow2.f32 %v2438_v18  ;;  %v2441_v57 = vmul.f32 -1.442695, %v3981_v9  ;;  %v2442_v29 = vmul.f32 -1.442695, %v3983_v30  ;;  %v1757_v45 = vmul.f32 %v1735_v16, %v3840_v26 }
 0xb6e   : > { %v2443_v23 = vmul.f32 -1.442695, %v3985_v42  ;;  %v2444_v55 = vmul.f32 -1.442695, %v3987_v43  ;;  %v1758_v53 = vmul.f32 %v1735_v16, %v3843_v20  ;;  %v1755_v51 = vmul.f32 %v1730_v7, %v3850_v54 }
 0xb6f   : > { %2948 = vpow2.f32 %v2441_v57  ;;  %v3996_v1 = vadd.f32 %v1785_v58, %v1757_v45  ;;  %v1756_v25 = vmul.f32 %v1730_v7, %v3853_v33 }
 0xb70   : > { %2950 = vpow2.f32 %v2442_v29  ;;  %v3999_v3 = vadd.f32 %v1785_v58, %v1758_v53  ;;  %v4001_v61 = vadd.f32 %v1781_v63, %v1755_v51  ;;  %v1740_v52 = vpop.permute.xlu0 %1739  ;;  %v1745_v39 = vpop.permute.xlu1 %1744 }
 0xb71   : > { %2952 = vpow2.f32 %v2443_v23  ;;  %v2447_v26 = vmul.f32 -1.442695, %v3996_v1  ;;  %v4004_v60 = vadd.f32 %v1781_v63, %v1756_v25  ;;  %v1759_v13 = vmul.f32 %v1740_v52, %v3860_v4 }
 0xb72   : > { %2954 = vpow2.f32 %v2444_v55  ;;  %v2448_v20 = vmul.f32 -1.442695, %v3999_v3  ;;  %v2445_v54 = vmul.f32 -1.442695, %v4001_v61  ;;  %v1760_v46 = vmul.f32 %v1740_v52, %v3863_v22 }
 0xb73   : > { %2956 = vpow2.f32 %v2447_v26  ;;  %v2446_v17 = vmul.f32 -1.442695, %v4004_v60  ;;  %v1761_v34 = vmul.f32 %v1745_v39, %v3870_v31  ;;  %v1762_v44 = vmul.f32 %v1745_v39, %v3873_v32 }
 0xb74   : > { %v2941_v33 = vpop.eup %2940  ;;  %2958 = vpow2.f32 %v2448_v20 }
 0xb75   : > { %v2943_v28 = vpop.eup %2942  ;;  %v1861_v11 = vadd.f32 1.0, %v2941_v33  ;;  %2960 = vpow2.f32 %v2445_v54  ;;  %v1789_v14 = vpop.permute.xlu0 %1788 }
 0xb76   : > { %v2945_v59 = vpop.eup %2944  ;;  %v1862_v40 = vadd.f32 1.0, %v2943_v28  ;;  %2962 = vpow2.f32 %v2446_v17  ;;  %v4010_v21 = vadd.f32 %v1789_v14, %v1759_v13  ;;  %v1793_v6 = vpop.permute.xlu1 %1792  ;;  %v4016_v47 = vadd.f32 %v1789_v14, %v1760_v46 }
 0xb77   : > { %v2947_v56 = vpop.eup %2946  ;;  %2964 = vrcp.f32 %v1861_v11  ;;  %v1859_v24 = vadd.f32 1.0, %v2945_v59  ;;  %v4018_v18 = vadd.f32 %v1793_v6, %v1761_v34  ;;  %v4020_v27 = vadd.f32 %v1793_v6, %v1762_v44 }
 0xb78   : > { %2966 = vrcp.f32 %v1862_v40  ;;  %v1860_v35 = vadd.f32 1.0, %v2947_v56  ;;  %v2449_v63 = vmul.f32 -1.442695, %v4010_v21  ;;  %v2450_v32 = vmul.f32 -1.442695, %v4016_v47 }
 0xb79   : > { %v2949_v12 = vpop.eup %2948  ;;  %2968 = vrcp.f32 %v1859_v24  ;;  %v2451_v29 = vmul.f32 -1.442695, %v4018_v18  ;;  %v2452_v55 = vmul.f32 -1.442695, %v4020_v27 }
 0xb7a   : > { %v2951_v4 = vpop.eup %2950  ;;  %2970 = vrcp.f32 %v1860_v35  ;;  %v1863_v58 = vadd.f32 1.0, %v2949_v12 }
 0xb7b   : > { %v2953_v50 = vpop.eup %2952  ;;  %v1864_v2 = vadd.f32 1.0, %v2951_v4  ;;  %2972 = vpow2.f32 %v2449_v63 }
 0xb7c   : > { %v2955_v62 = vpop.eup %2954  ;;  %2974 = vrcp.f32 %v1863_v58  ;;  %v1865_v10 = vadd.f32 1.0, %v2953_v50 }
 0xb7d   : > { %v2957_v48 = vpop.eup %2956  ;;  %2976 = vrcp.f32 %v1864_v2  ;;  %v1866_v49 = vadd.f32 1.0, %v2955_v62 }
 0xb7e   : > { %v2959_v19 = vpop.eup %2958  ;;  %2978 = vrcp.f32 %v1865_v10  ;;  %v1869_v22 = vadd.f32 1.0, %v2957_v48 }
 0xb7f   : > { %v2961_v41 = vpop.eup %2960  ;;  %2980 = vrcp.f32 %v1866_v49  ;;  %v1870_v31 = vadd.f32 1.0, %v2959_v19  ;;  %v2840_v19 = vld [vmem:[%s4112_s3] sm:$0xff]  }
 0xb80   : > { %v2963_v15 = vpop.eup %2962  ;;  %2982 = vrcp.f32 %v1869_v22  ;;  %v1867_v16 = vadd.f32 1.0, %v2961_v41  ;;  %v3161_v22 = vmov 7  }
 0xb81   : > { %v2965_v7 = vpop.eup %2964  ;;  %2984 = vrcp.f32 %v1870_v31  ;;  %v1868_v57 = vadd.f32 1.0, %v2963_v15  ;;  %2827 = vset.pattern.permute.xlu0 %v3161_v22  ;;  %v2163_v31 = vpop.permute.xlu0 %2162 }
 0xb82   : > { %v2967_v45 = vpop.eup %2966  ;;  %v1909_v23 = vmul.f32 %v2965_v7, %v3965_v8  ;;  %2986 = vrcp.f32 %v1867_v16  ;;  %2215 = vperm.xlu0 %2827, %v3913_v38  }
 0xb83   : > { %v2969_v53 = vpop.eup %2968  ;;  %v1910_v51 = vmul.f32 %v2967_v45, %v3967_v36  ;;  %2988 = vrcp.f32 %v1868_v57 }
 0xb84   : > { %v2971_v25 = vpop.eup %2970  ;;  %v1907_v52 = vmul.f32 %v2969_v53, %v3969_v37  ;;  %2990 = vpow2.f32 %v2450_v32 }
 0xb85   : > { %v2973_v26 = vpop.eup %2972  ;;  %v1908_v20 = vmul.f32 %v2971_v25, %v3971_v5  ;;  %2992 = vpow2.f32 %v2451_v29 }
 0xb86   : > { %v2975_v54 = vpop.eup %2974  ;;  %2994 = vpow2.f32 %v2452_v55  ;;  %v1931_v17 = vpack.c.bf16 %v1909_v23, %v1907_v52  ;;  %v1871_v59 = vadd.f32 1.0, %v2973_v26 }
 0xb87   : > { %v2977_v33 = vpop.eup %2976  ;;  %v1911_v8 = vmul.f32 %v2975_v54, %v3981_v9  ;;  %v1932_v13 = vpack.c.bf16 %v1910_v51, %v1908_v20 }
 0xb88   : > { %v2979_v39 = vpop.eup %2978  ;;  %v1912_v28 = vmul.f32 %v2977_v33, %v3983_v30  ;;  %2996 = vrcp.f32 %v1871_v59 }
 0xb89   : > { %v2981_v36 = vpop.eup %2980  ;;  %v1913_v11 = vmul.f32 %v2979_v39, %v3985_v42  ;;  %2084 = vmatprep.subr.bf16.mxu0 %v1932_v13 }
 0xb8a   : > { %v2983_v37 = vpop.eup %2982  ;;  %v1914_v14 = vmul.f32 %v2981_v36, %v3987_v43  ;;  %2085 = vmatpush1.bf16.msra.mxu0 %v1931_v17  ;;  %v2175_v36 = vpop.permute.xlu0 %2174 }
 0xb8b   : > { %v2985_v5 = vpop.eup %2984  ;;  %v1917_v40 = vmul.f32 %v2983_v37, %v3996_v1  ;;  %v1933_v56 = vpack.c.bf16 %v1913_v11, %v1911_v8 }
 0xb8c   : > { %v2987_v24 = vpop.eup %2986  ;;  %v1918_v9 = vmul.f32 %v2985_v5, %v3999_v3  ;;  %v1934_v35 = vpack.c.bf16 %v1914_v14, %v1912_v28 }
 0xb8d   : > { %v2989_v63 = vpop.eup %2988  ;;  %v1915_v30 = vmul.f32 %v2987_v24, %v4001_v61 }
 0xb8e   : > { %v2991_v12 = vpop.eup %2990  ;;  %v1916_v42 = vmul.f32 %v2989_v63, %v4004_v60  ;;  %2086 = vmatprep.subr.bf16.mxu0 %v1934_v35 }
 0xb8f   : > { %v2993_v4 = vpop.eup %2992  ;;  %v1872_v43 = vadd.f32 1.0, %v2991_v12  ;;  %2087 = vmatpush1.bf16.msra.mxu0 %v1933_v56  ;;  %v1935_v58 = vpack.c.bf16 %v1917_v40, %v1915_v30  ;;  %v2183_v30 = vpop.permute.xlu0 %2182 }
 0xb90   : > { %v2995_v46 = vpop.eup %2994  ;;  %v1873_v6 = vadd.f32 1.0, %v2993_v4  ;;  %v1936_v1 = vpack.c.bf16 %v1918_v9, %v1916_v42 }
 0xb91   : > { %2998 = vrcp.f32 %v1872_v43  ;;  %v1874_v50 = vadd.f32 1.0, %v2995_v46 }
 0xb92   : > { %3000 = vrcp.f32 %v1873_v6  ;;  %2088 = vmatprep.subr.bf16.mxu0 %v1936_v1  ;;  %v2997_v3 = vpop.eup %2996 }
 0xb93   : > { %3002 = vrcp.f32 %v1874_v50  ;;  %2089 = vmatpush1.bf16.msra.mxu0 %v1935_v58  ;;  %v1919_v2 = vmul.f32 %v2997_v3, %v4010_v21  ;;  %v2841_v21 = vld [vmem:[%s4112_s3 + $0x8] sm:$0xff]   ;;  %v2205_v50 = vld [vmem:[#allocation5] sm:$0xf] }
 0xb9b   : > { %v2999_v61 = vpop.eup %2998 }
 0xb9c   : > { %v3001_v60 = vpop.eup %3000  ;;  %v1920_v34 = vmul.f32 %v2999_v61, %v4016_v47  ;;  %v2842_v47 = vld [vmem:[%s4112_s3 + $0x10] sm:$0xff]  }
 0xb9d   : > { %v3003_v62 = vpop.eup %3002  ;;  %v1921_v10 = vmul.f32 %v3001_v60, %v4018_v18  ;;  %v2843_v18 = vld [vmem:[%s4112_s3 + $0x18] sm:$0xff]  }
 0xb9e   : > { %v1922_v44 = vmul.f32 %v3003_v62, %v4020_v27  ;;  %v2159_v27 = vpop.permute.xlu1 %2158 }
 0xb9f   : > { %v1937_v48 = vpack.c.bf16 %v1921_v10, %v1919_v2 }
 0xba0   : > { %v1938_v49 = vpack.c.bf16 %v1922_v44, %v1920_v34 }
 0xba2   : > { %2090 = vmatprep.subr.bf16.mxu0 %v1938_v49  ;;  %v2167_v45 = vpop.permute.xlu1 %2166 }
 0xba3   : > { %2091 = vmatpush1.bf16.msra.mxu0 %v1937_v48 }
 0xba6   : > { %2465 = vmatmul.mubr.msk.bf16.vlgmr.msra.gmra.mrb[16].mxu0 %vm533_vm1, %v2840_v19  ;;  %v2171_v52 = vpop.permute.xlu1 %2170 }
 0xba7   : > { %2126 = vmatprep.mubr.bf16.mxu0 %v3152_v0 }
 0xbaa   : > { %v2179_v28 = vpop.permute.xlu1 %2178 }
 0xbae   : > { %2466 = vmatmul.mubr.msk.bf16.gmra.mrb[20].mxu0 %vm533_vm1, %v2841_v21  ;;  %v2187_v35 = vpop.permute.xlu1 %2186 }
 0xbaf   : > { %2136 = vmatprep.mubr.bf16.mxu0 %v3152_v0 }
 0xbb6   : > { %2467 = vmatmul.mubr.msk.bf16.gmra.mrb[24].mxu0 %vm533_vm1, %v2842_v47 }
 0xbb7   : > { %2146 = vmatprep.mubr.bf16.mxu0 %v3152_v0 }
 0xbbe   : > { %2468 = vmatmul.mubr.msk.bf16.gmra.mrb[28].mxu0 %vm533_vm1, %v2843_v18 }
 0xc01   : > { %v2216_v3 = vpop.permute.xlu0 %2215 }
 0xc79   : > { %v2118_v41 = vpop.f32.mrb[16].mxu0 }
 0xc7a   : > { %v2120_v15 = vpop.f32.mrb[17].mxu0  ;;  %v2189_v32 = vadd.f32 %v2159_v27, %v2118_v41 }
 0xc7b   : > { %v2122_v16 = vpop.f32.mrb[18].mxu0  ;;  %v2190_v29 = vadd.f32 %v2159_v27, %v2120_v15 }
 0xc7c   : > { %v2191_v7 = vadd.f32 %v2163_v31, %v2122_v16  ;;  %v2124_v57 = vpop.f32.mrb[19].mxu0 }
 0xc7d   : > { %v2192_v0 = vadd.f32 %v2163_v31, %v2124_v57 }
 0xc7e   : > { %v2206_v23 = vpack.c.bf16 %v2191_v7, %v2189_v32 }
 0xc7f   : > { %v2207_v55 = vpack.c.bf16 %v2192_v0, %v2190_v29 }
 0xc81   : > { %v2128_v53 = vpop.f32.mrb[20].mxu0  ;;  %2221 = vmatprep.subr.bf16.mxu1 %v2207_v55 }
 0xc82   : > { %v2130_v51 = vpop.f32.mrb[21].mxu0  ;;  %2222 = vmatpush1.bf16.msra.mxu1 %v2206_v23  ;;  %v2193_v38 = vadd.f32 %v2167_v45, %v2128_v53 }
 0xc83   : > { %v2132_v25 = vpop.f32.mrb[22].mxu0  ;;  %v2194_v54 = vadd.f32 %v2167_v45, %v2130_v51 }
 0xc84   : > { %v2195_v26 = vadd.f32 %v2171_v52, %v2132_v25  ;;  %v2134_v20 = vpop.f32.mrb[23].mxu0 }
 0xc85   : > { %v2196_v17 = vadd.f32 %v2171_v52, %v2134_v20 }
 0xc86   : > { %v2208_v33 = vpack.c.bf16 %v2195_v26, %v2193_v38 }
 0xc87   : > { %v2209_v8 = vpack.c.bf16 %v2196_v17, %v2194_v54 }
 0xc89   : > { %v2138_v13 = vpop.f32.mrb[24].mxu0  ;;  %2223 = vmatprep.subr.bf16.mxu1 %v2209_v8 }
 0xc8a   : > { %v2140_v39 = vpop.f32.mrb[25].mxu0  ;;  %2224 = vmatpush1.bf16.msra.mxu1 %v2208_v33  ;;  %v2197_v37 = vadd.f32 %v2175_v36, %v2138_v13 }
 0xc8b   : > { %v2142_v11 = vpop.f32.mrb[26].mxu0  ;;  %v2198_v5 = vadd.f32 %v2175_v36, %v2140_v39 }
 0xc8c   : > { %v2199_v14 = vadd.f32 %v2179_v28, %v2142_v11  ;;  %v2144_v59 = vpop.f32.mrb[27].mxu0 }
 0xc8d   : > { %v2200_v40 = vadd.f32 %v2179_v28, %v2144_v59 }
 0xc8e   : > { %v2210_v56 = vpack.c.bf16 %v2199_v14, %v2197_v37 }
 0xc8f   : > { %v2211_v24 = vpack.c.bf16 %v2200_v40, %v2198_v5 }
 0xc91   : > { %v2148_v9 = vpop.f32.mrb[28].mxu0  ;;  %2225 = vmatprep.subr.bf16.mxu1 %v2211_v24 }
 0xc92   : > { %v2150_v63 = vpop.f32.mrb[29].mxu0  ;;  %2226 = vmatpush1.bf16.msra.mxu1 %v2210_v56  ;;  %v2201_v42 = vadd.f32 %v2183_v30, %v2148_v9 }
 0xc93   : > { %v2152_v12 = vpop.f32.mrb[30].mxu0  ;;  %v2202_v58 = vadd.f32 %v2183_v30, %v2150_v63 }
 0xc94   : > { %v2203_v4 = vadd.f32 %v2187_v35, %v2152_v12  ;;  %v2154_v43 = vpop.f32.mrb[31].mxu0 }
 0xc95   : > { %v2204_v46 = vadd.f32 %v2187_v35, %v2154_v43 }
 0xc96   : > { %v2212_v6 = vpack.c.bf16 %v2203_v4, %v2201_v42 }
 0xc97   : > { %v2213_v1 = vpack.c.bf16 %v2204_v46, %v2202_v58 }
 0xc99   : > { %2227 = vmatprep.subr.bf16.mxu1 %v2213_v1 }
 0xc9a   : > { %2228 = vmatpush1.bf16.msra.mxu1 %v2212_v6 }
 0xc9d   : > { %2469 = vmatmul.mubr.msk.bf16.vlgmr.msra.gmra.mrb[48].mxu1 %vm533_vm1, %v2205_v50 }
 0xd70   : > { %v2255_v61 = vpop.f32.mrb[48].mxu1 }
 0xd71   : > { %v2257_v2 = vpop.f32.mrb[49].mxu1  ;;  %v2256_v60 = vadd.f32 %v2255_v61, %v2216_v3 }
 0xd72   : > { %v2259_v34 = vpop.f32.mrb[50].mxu1  ;;  %v2258_v62 = vadd.f32 %v2257_v2, %v2216_v3 }
 0xd73   : > { %2264 = vst [vmem:[%s326_s10] sm:$0xff] %v2256_v60  ;;  %v2260_v10 = vpop.f32.mrb[51].mxu1 }
 0xd74   : > { %2265 = vst [vmem:[%s326_s10 + $0x8] sm:$0xff] %v2258_v62 }
 0xd75   : > { %3089 = shalt.err (!%p3086_p11)
}
 0xd76   : > { %s3090_s22 = scalar_lea.hbm %s4067_s19, 256  ;;  %s3094_s24 = scalar_lea.hbm %s4117_s8, 512 }
 0xd77   : > { %p3091_p13 = scmp.ne.s32.totalorder %s4067_s19, %s3090_s22  ;;  %p3095_p6 = scmp.lt.u32.totalorder %s4067_s19, %s4117_s8 }
 0xd78   : > { %p3096_p9 = scmp.lt.u32.totalorder %s3094_s24, %s3090_s22  ;;  %p3098_p12 = scmp.lt.u32.totalorder %s3090_s22, %s4067_s19 }
 0xd79   : > { %p3092_p5 = pnand %p3091_p13, %p4133_p1 }
 0xd7a   : > { %p3097_p10 = por %p3096_p9, %p3095_p6 }
 0xd7b   : > { %p3093_p0 = pneg %p3092_p5 }
 0xd7c   : > { %p3099_p2 = por %p3098_p12, %p3097_p10 }
 0xd7e   : > { %p3100_p3 = pnand %p3099_p2, %p3093_p0 }
 0xd80   : > { %3103 = shalt.err (!%p3100_p3)
}
 0xd81   : > { %2741 = dma.vmem_to_hbm [thread:$0]  (%p4133_p1), %s4069_s12, 256, %s4067_s19, %s2267_s9  }
 0xd82 PF: > { %p2758_p4 = scmp.ge.s32.totalorder %s3146_s30, 2  ;;  %s2293_s10 = sand.u32 1, %s3134_s27  }
 0xd83   : > { %p4134_p7 = scmp.ne.s32.totalorder %s4125_s16, 0  ;;  %s2294_s13 = scalar_lea.sflag [#allocation4], %s2293_s10 }
 0xd85   : > { %p2751_p8 = pnand %p2758_p4, %p4134_p7 }
 0xd87   : > { %3129 = dma.done.wait (!%p2751_p8), %s2294_s13, 256  }
 0xd88   : > { %3131 = vsyncadd (!%p2751_p8), %s2294_s13, 4294967040  ;;  %s4135_s18 = sld [smem:[#allocation11_spill]]  ;;  %s4136_s29 = sld [smem:[#allocation12_spill]] }
 0xd89   : > { %p20_p11 = scmp.ge.s32.totalorder %s3233_s11, 4   ;;  %s4137_s27 = smov %s3138_s28 }
 0xd8a   : > { %s4139_s30 = smov %s3233_s11 }
 0xd8b   :  { %22 = sbr.rel (!%p20_p11) target bundleno = 5 (0x5), region = 96 }
 0xd8e   : > { %s4138_s28 = smov %s4135_s18 }
 0xd92   :  { %2299 = vsyncpa [#allocation3], 1 }
 0xd93   :  { %2301 = vsyncpa [#allocation3 + $0x1], 1 }
 0xd94   :  { %2302 = vsyncpa [#allocation6], 1 }
 0xd95   :  { %2303 = vsyncpa [#allocation4], 1 }
 0xd96   :  { %2305 = vsyncpa [#allocation4 + $0x1], 1 }

</bundles_post_ra>
